<compile_context>
chip_gen: v5e
topology: v5e:2x2
jax: 0.10.0
libtpu: 0.0.40
codegen_flags: <defaults>
</compile_context>

<pallas_src>
import math

import jax
import jax.numpy as jnp
from jax.experimental import pallas as pl
from jax.experimental.pallas import tpu as pltpu


# ----------------------------------------------------------------------------
# Fused conv-stack Pallas kernel
# ----------------------------------------------------------------------------
def _make_stack_kernel(num_layers, relu_flags, emit_full, emit_sum):
    """Build a kernel that chains `num_layers` 1x1 convs in VMEM.

    Ref order: x, (w_0, b_0), ..., (w_{L-1}, b_{L-1}), [sum_matrix],
               [out_full], [out_sum]
    """
    def kernel(*refs):
        x_ref = refs[0]
        wb_refs = refs[1:1 + 2 * num_layers]
        pos = 1 + 2 * num_layers
        s_ref = None
        if emit_sum:
            s_ref = refs[pos]
            pos += 1
        out_refs = refs[pos:]

        y = x_ref[...]                                   # (C_in, M)
        for i in range(num_layers):
            w = wb_refs[2 * i][...]                      # (C_out_i, C_in_i)
            b = wb_refs[2 * i + 1][...]                  # (C_out_i, 1)
            y = jnp.dot(w, y, preferred_element_type=jnp.float32) + b
            if relu_flags[i]:
                y = jnp.maximum(y, 0.0)

        oi = 0
        if emit_full:
            out_refs[oi][...] = y.astype(out_refs[oi].dtype)
            oi += 1
        if emit_sum:
            # Fused torch .sum(dim=2): y (C_out, M) @ S (M, B*W) -> (C_out, B*W)
            out_refs[oi][...] = jnp.dot(
                y, s_ref[...], preferred_element_type=jnp.float32
            ).astype(out_refs[oi].dtype)

    return kernel


def fused_conv_stack(x2d, params, relu_flags, *, sum_matrix=None, emit_full=True):
    """Run a whole 1x1-conv stack in a single pallas_call.

    x2d:    (C_in, M) channels-first slab (spatial positions on the lane axis)
    params: [(w_i (C_out_i, C_in_i), b_i (C_out_i, 1)), ...]
    Returns (full, sum), full, or sum depending on the emit flags.
    """
    C_in, M = x2d.shape
    num_layers = len(params)
    C_out = params[-1][0].shape[0]
    emit_sum = sum_matrix is not None
    assert emit_full or emit_sum

    inputs = [x2d]
    in_specs = [pl.BlockSpec(x2d.shape, lambda i: (0, 0))]
    for (w, b) in params:
        inputs += [w, b]
        in_specs += [pl.BlockSpec(w.shape, lambda i: (0, 0)),
                     pl.BlockSpec(b.shape, lambda i: (0, 0))]
    if emit_sum:
        inputs.append(sum_matrix)
        in_specs.append(pl.BlockSpec(sum_matrix.shape, lambda i: (0, 0)))

    out_shapes, out_specs = [], []
    if emit_full:
        out_shapes.append(jax.ShapeDtypeStruct((C_out, M), jnp.float32))
        out_specs.append(pl.BlockSpec((C_out, M), lambda i: (0, 0)))
    if emit_sum:
        ncols = sum_matrix.shape[1]
        out_shapes.append(jax.ShapeDtypeStruct((C_out, ncols), jnp.float32))
        out_specs.append(pl.BlockSpec((C_out, ncols), lambda i: (0, 0)))

    outs = pl.pallas_call(
        _make_stack_kernel(num_layers, tuple(relu_flags), emit_full, emit_sum),
        grid=(1,),
        in_specs=in_specs,
        out_specs=tuple(out_specs),
        out_shape=tuple(out_shapes),
        compiler_params=pltpu.CompilerParams(
            dimension_semantics=("arbitrary",)),
    )(*inputs)

    if emit_full and emit_sum:
        return outs[0], outs[1]
    return outs[0]


# ----------------------------------------------------------------------------
# Parameter init (mirrors torch xavier_uniform_ + bias=0.01), deterministic
# ----------------------------------------------------------------------------
def _xavier_uniform(key, c_in, c_out):
    bound = math.sqrt(6.0 / (c_in + c_out))
    # stored as (C_out, C_in) so the kernel computes w @ x directly
    return jax.random.uniform(key, (c_out, c_in), jnp.float32, -bound, bound)


def _init_conv_stack(key, dims):
    """dims: list of (c_in, c_out) per layer -> list of (w, b)."""
    params = []
    for i, (ci, co) in enumerate(dims):
        w = _xavier_uniform(jax.random.fold_in(key, i), ci, co)
        b = jnp.full((co, 1), 0.01, jnp.float32)
        params.append((w, b))
    return params


def init_network_params(key, pair_blocks, base_channels, layers):
    params = {}
    channels = [22, base_channels]
    params["pair_block_1"] = _init_conv_stack(
        jax.random.fold_in(key, 1),
        [(22, base_channels)] + [(base_channels, base_channels)] * (layers - 1),
    )
    for index in range(2, pair_blocks + 1):
        channels.append(2 * channels[-1] + sum(channels[:-1]))
        c = channels[-1]
        params[f"pair_block_{index}"] = _init_conv_stack(
            jax.random.fold_in(key, index), [(c, c)] * layers
        )
    c_pred = sum(channels[1:]) + 9
    params["pred"] = _init_conv_stack(
        jax.random.fold_in(key, 1000),
        [(c_pred, c_pred)] * (layers - 1) + [(c_pred, 1)],
    )
    return params


# ----------------------------------------------------------------------------
# Network forward (layout glue in plain JAX on tiny tensors, compute in Pallas)
# ----------------------------------------------------------------------------
def network_apply(params, single, pairs, pair_blocks, size):
    B = single.shape[0]
    H, W = size - 1, size
    M = B * H * W

    # 0/1 reduction matrix for the fused torch .sum(dim=2):
    # S[b*H*W + h*W + w, b*W + w] = 1
    m = jnp.arange(M)
    col = (m // (H * W)) * W + (m % W)
    S = (col[:, None] == jnp.arange(B * W)[None, :]).astype(jnp.float32)

    # Canonical internal layout: channels-first (C, B, H, W); flattening the
    # trailing (B, H, W) onto the lane axis is a free reshape.
    pairs_cf = jnp.transpose(pairs, (1, 0, 2, 3))            # (22, B, H, W)

    def run_block(block_params, x_cf, need_full):
        C_in = x_cf.shape[0]
        outs = fused_conv_stack(
            x_cf.reshape(C_in, M), block_params,
            relu_flags=(True,) * len(block_params),
            sum_matrix=S, emit_full=need_full)
        if need_full:
            full, summed = outs
            c = full.shape[0]
            return full.reshape(c, B, H, W), summed.reshape(summed.shape[0], B, W)
        summed = outs
        return None, summed.reshape(summed.shape[0], B, W)

    # Block k's full output is only consumed by blocks k+2..pair_blocks.
    pb1_full, pb1_sum = run_block(params["pair_block_1"], pairs_cf,
                                  need_full=(pair_blocks >= 3))
    pair_list_cf = [pairs_cf, pb1_full]
    sums = {1: pb1_sum}

    # roll indices: gathered[..., d, j] = x[..., (j - (d+1)) mod size]
    d = jnp.arange(1, size)
    j = jnp.arange(size)
    idx = (j[None, :] - d[:, None]) % size                    # (H, W)

    for index in range(2, pair_blocks + 1):
        x = sums[index - 1]                                   # (C_prev, B, W)
        C_prev = x.shape[0]
        x_rep = jnp.broadcast_to(x[:, :, None, :], (C_prev, B, H, W))
        gathered = x[:, :, idx]                               # (C_prev, B, H, W)
        pair_matrix = jnp.concatenate([x_rep, gathered], axis=0)
        pairs_cat = jnp.concatenate(pair_list_cf[:-1] + [pair_matrix], axis=0)
        full, summed = run_block(params[f"pair_block_{index}"], pairs_cat,
                                 need_full=(index <= pair_blocks - 2))
        pair_list_cf.append(full)
        sums[index] = summed

    # pred network over the channels-first (C_pred, B*W) slab
    single_cf = jnp.transpose(single, (1, 0, 2))              # (9, B, W)
    cat_cf = jnp.concatenate(
        [single_cf] + [sums[i] for i in range(1, pair_blocks + 1)], axis=0)
    C_pred = cat_cf.shape[0]
    n = len(params["pred"])
    pred = fused_conv_stack(
        cat_cf.reshape(C_pred, B * W), params["pred"],
        relu_flags=(True,) * (n - 1) + (False,),
        sum_matrix=None, emit_full=True)                      # (1, B*W)
    return pred.reshape(B, W)


# ----------------------------------------------------------------------------
if __name__ == "__main__":
    B, size = 2, 16
    pair_blocks, base_channels, layers = 2, 8, 2

    key = jax.random.PRNGKey(0)
    k_single, k_pairs, k_params = jax.random.split(key, 3)
    single = jax.random.normal(k_single, (B, 9, size), jnp.float32)
    pairs = jax.random.normal(k_pairs, (B, 22, size - 1, size), jnp.float32)

    params = init_network_params(k_params, pair_blocks, base_channels, layers)

    fwd = jax.jit(network_apply, static_argnums=(3, 4))
    out = fwd(params, single, pairs, pair_blocks, size)
    out = jax.block_until_ready(out)

    assert out.shape == (B, size), out.shape
    assert bool(jnp.all(jnp.isfinite(out)))
    print("KERNEL_OK")
</pallas_src>

<mosaic_0001>
module attributes {stable_mosaic.version = 11 : i64} {
  func.func @kernel(%arg0: i32, %arg1: memref<22x480xf32, #tpu.memory_space<vmem>>, %arg2: memref<8x22xf32, #tpu.memory_space<vmem>>, %arg3: memref<8x1xf32, #tpu.memory_space<vmem>>, %arg4: memref<8x8xf32, #tpu.memory_space<vmem>>, %arg5: memref<8x1xf32, #tpu.memory_space<vmem>>, %arg6: memref<480x32xf32, #tpu.memory_space<vmem>>, %arg7: memref<8x32xf32, #tpu.memory_space<vmem>>) attributes {dimension_semantics = [#tpu.dimension_semantics<arbitrary>], iteration_bounds = array<i64: 1>, scalar_prefetch = 0 : i64, scratch_operands = 0 : i64, tpu.core_type = #tpu.core_type<tc>, window_params = [{pipeline_mode = #tpu.pipeline_mode<synchronous>, transform_indices = @transform_0, window_bounds = array<i64: 22, 480>}, {pipeline_mode = #tpu.pipeline_mode<synchronous>, transform_indices = @transform_1, window_bounds = array<i64: 8, 22>}, {pipeline_mode = #tpu.pipeline_mode<synchronous>, transform_indices = @transform_2, window_bounds = array<i64: 8, 1>}, {pipeline_mode = #tpu.pipeline_mode<synchronous>, transform_indices = @transform_3, window_bounds = array<i64: 8, 8>}, {pipeline_mode = #tpu.pipeline_mode<synchronous>, transform_indices = @transform_4, window_bounds = array<i64: 8, 1>}, {pipeline_mode = #tpu.pipeline_mode<synchronous>, transform_indices = @transform_5, window_bounds = array<i64: 480, 32>}, {pipeline_mode = #tpu.pipeline_mode<synchronous>, transform_indices = @transform_6, window_bounds = array<i64: 8, 32>}]} {
    %c0 = arith.constant 0 : index
    %c0_0 = arith.constant 0 : index
    %0 = vector.load %arg1[%c0, %c0_0] : memref<22x480xf32, #tpu.memory_space<vmem>>, vector<22x480xf32>
    %c0_1 = arith.constant 0 : index
    %c0_2 = arith.constant 0 : index
    %1 = vector.load %arg2[%c0_1, %c0_2] : memref<8x22xf32, #tpu.memory_space<vmem>>, vector<8x22xf32>
    %c0_3 = arith.constant 0 : index
    %c0_4 = arith.constant 0 : index
    %2 = vector.load %arg3[%c0_3, %c0_4] : memref<8x1xf32, #tpu.memory_space<vmem>>, vector<8x1xf32>
    %cst = arith.constant dense<0.000000e+00> : vector<8x480xf32>
    %3 = tpu.matmul %1, %0, %cst {dimension_numbers = #tpu.dot_dimension_numbers<[1], [0], [0], [1], [0, 0, 1, 1], [], []>} : vector<8x22xf32>, vector<22x480xf32>, vector<8x480xf32> -> vector<8x480xf32>
    %4 = vector.broadcast %2 : vector<8x1xf32> to vector<8x480xf32>
    %5 = arith.addf %3, %4 : vector<8x480xf32>
    %cst_5 = arith.constant 0.000000e+00 : f32
    %6 = vector.broadcast %cst_5 : f32 to vector<8x480xf32>
    %7 = arith.maximumf %5, %6 : vector<8x480xf32>
    %c0_6 = arith.constant 0 : index
    %c0_7 = arith.constant 0 : index
    %8 = vector.load %arg4[%c0_6, %c0_7] : memref<8x8xf32, #tpu.memory_space<vmem>>, vector<8x8xf32>
    %c0_8 = arith.constant 0 : index
    %c0_9 = arith.constant 0 : index
    %9 = vector.load %arg5[%c0_8, %c0_9] : memref<8x1xf32, #tpu.memory_space<vmem>>, vector<8x1xf32>
    %cst_10 = arith.constant dense<0.000000e+00> : vector<8x480xf32>
    %10 = tpu.matmul %8, %7, %cst_10 {dimension_numbers = #tpu.dot_dimension_numbers<[1], [0], [0], [1], [0, 0, 1, 1], [], []>} : vector<8x8xf32>, vector<8x480xf32>, vector<8x480xf32> -> vector<8x480xf32>
    %11 = vector.broadcast %9 : vector<8x1xf32> to vector<8x480xf32>
    %12 = arith.addf %10, %11 : vector<8x480xf32>
    %cst_11 = arith.constant 0.000000e+00 : f32
    %13 = vector.broadcast %cst_11 : f32 to vector<8x480xf32>
    %14 = arith.maximumf %12, %13 : vector<8x480xf32>
    %c0_12 = arith.constant 0 : index
    %c0_13 = arith.constant 0 : index
    %15 = vector.load %arg6[%c0_12, %c0_13] : memref<480x32xf32, #tpu.memory_space<vmem>>, vector<480x32xf32>
    %cst_14 = arith.constant dense<0.000000e+00> : vector<8x32xf32>
    %16 = tpu.matmul %14, %15, %cst_14 {dimension_numbers = #tpu.dot_dimension_numbers<[1], [0], [0], [1], [0, 0, 1, 1], [], []>} : vector<8x480xf32>, vector<480x32xf32>, vector<8x32xf32> -> vector<8x32xf32>
    %c0_15 = arith.constant 0 : index
    %c0_16 = arith.constant 0 : index
    %17 = vector.load %arg7[%c0_15, %c0_16] : memref<8x32xf32, #tpu.memory_space<vmem>>, vector<8x32xf32>
    tpu.vector_store %arg7[%c0_15, %c0_16], %16 {strides = array<i32>} : memref<8x32xf32, #tpu.memory_space<vmem>>, vector<8x32xf32>,
    return
  }
  func.func @transform_0(%arg0: i32) -> (i32, i32) {
    %c0_i32 = arith.constant 0 : i32
    %c0_i32_0 = arith.constant 0 : i32
    %c0_i32_1 = arith.constant 0 : i32
    return %c0_i32, %c0_i32_0 : i32, i32
  }
  func.func @transform_1(%arg0: i32) -> (i32, i32) {
    %c0_i32 = arith.constant 0 : i32
    %c0_i32_0 = arith.constant 0 : i32
    %c0_i32_1 = arith.constant 0 : i32
    return %c0_i32, %c0_i32_0 : i32, i32
  }
  func.func @transform_2(%arg0: i32) -> (i32, i32) {
    %c0_i32 = arith.constant 0 : i32
    %c0_i32_0 = arith.constant 0 : i32
    %c0_i32_1 = arith.constant 0 : i32
    return %c0_i32, %c0_i32_0 : i32, i32
  }
  func.func @transform_3(%arg0: i32) -> (i32, i32) {
    %c0_i32 = arith.constant 0 : i32
    %c0_i32_0 = arith.constant 0 : i32
    %c0_i32_1 = arith.constant 0 : i32
    return %c0_i32, %c0_i32_0 : i32, i32
  }
  func.func @transform_4(%arg0: i32) -> (i32, i32) {
    %c0_i32 = arith.constant 0 : i32
    %c0_i32_0 = arith.constant 0 : i32
    %c0_i32_1 = arith.constant 0 : i32
    return %c0_i32, %c0_i32_0 : i32, i32
  }
  func.func @transform_5(%arg0: i32) -> (i32, i32) {
    %c0_i32 = arith.constant 0 : i32
    %c0_i32_0 = arith.constant 0 : i32
    %c0_i32_1 = arith.constant 0 : i32
    return %c0_i32, %c0_i32_0 : i32, i32
  }
  func.func @transform_6(%arg0: i32) -> (i32, i32) {
    %c0_i32 = arith.constant 0 : i32
    %c0_i32_0 = arith.constant 0 : i32
    %c0_i32_1 = arith.constant 0 : i32
    return %c0_i32, %c0_i32_0 : i32, i32
  }
}

module attributes {stable_mosaic.version = 11 : i64} {
  func.func @kernel(%arg0: i32, %arg1: memref<38x480xf32, #tpu.memory_space<vmem>>, %arg2: memref<38x38xf32, #tpu.memory_space<vmem>>, %arg3: memref<38x1xf32, #tpu.memory_space<vmem>>, %arg4: memref<38x38xf32, #tpu.memory_space<vmem>>, %arg5: memref<38x1xf32, #tpu.memory_space<vmem>>, %arg6: memref<480x32xf32, #tpu.memory_space<vmem>>, %arg7: memref<38x32xf32, #tpu.memory_space<vmem>>) attributes {dimension_semantics = [#tpu.dimension_semantics<arbitrary>], iteration_bounds = array<i64: 1>, scalar_prefetch = 0 : i64, scratch_operands = 0 : i64, tpu.core_type = #tpu.core_type<tc>, window_params = [{pipeline_mode = #tpu.pipeline_mode<synchronous>, transform_indices = @transform_0, window_bounds = array<i64: 38, 480>}, {pipeline_mode = #tpu.pipeline_mode<synchronous>, transform_indices = @transform_1, window_bounds = array<i64: 38, 38>}, {pipeline_mode = #tpu.pipeline_mode<synchronous>, transform_indices = @transform_2, window_bounds = array<i64: 38, 1>}, {pipeline_mode = #tpu.pipeline_mode<synchronous>, transform_indices = @transform_3, window_bounds = array<i64: 38, 38>}, {pipeline_mode = #tpu.pipeline_mode<synchronous>, transform_indices = @transform_4, window_bounds = array<i64: 38, 1>}, {pipeline_mode = #tpu.pipeline_mode<synchronous>, transform_indices = @transform_5, window_bounds = array<i64: 480, 32>}, {pipeline_mode = #tpu.pipeline_mode<synchronous>, transform_indices = @transform_6, window_bounds = array<i64: 38, 32>}]} {
    %c0 = arith.constant 0 : index
    %c0_0 = arith.constant 0 : index
    %0 = vector.load %arg1[%c0, %c0_0] : memref<38x480xf32, #tpu.memory_space<vmem>>, vector<38x480xf32>
    %c0_1 = arith.constant 0 : index
    %c0_2 = arith.constant 0 : index
    %1 = vector.load %arg2[%c0_1, %c0_2] : memref<38x38xf32, #tpu.memory_space<vmem>>, vector<38x38xf32>
    %c0_3 = arith.constant 0 : index
    %c0_4 = arith.constant 0 : index
    %2 = vector.load %arg3[%c0_3, %c0_4] : memref<38x1xf32, #tpu.memory_space<vmem>>, vector<38x1xf32>
    %cst = arith.constant dense<0.000000e+00> : vector<38x480xf32>
    %3 = tpu.matmul %1, %0, %cst {dimension_numbers = #tpu.dot_dimension_numbers<[1], [0], [0], [1], [0, 0, 1, 1], [], []>} : vector<38x38xf32>, vector<38x480xf32>, vector<38x480xf32> -> vector<38x480xf32>
    %4 = vector.broadcast %2 : vector<38x1xf32> to vector<38x480xf32>
    %5 = arith.addf %3, %4 : vector<38x480xf32>
    %cst_5 = arith.constant 0.000000e+00 : f32
    %6 = vector.broadcast %cst_5 : f32 to vector<38x480xf32>
    %7 = arith.maximumf %5, %6 : vector<38x480xf32>
    %c0_6 = arith.constant 0 : index
    %c0_7 = arith.constant 0 : index
    %8 = vector.load %arg4[%c0_6, %c0_7] : memref<38x38xf32, #tpu.memory_space<vmem>>, vector<38x38xf32>
    %c0_8 = arith.constant 0 : index
    %c0_9 = arith.constant 0 : index
    %9 = vector.load %arg5[%c0_8, %c0_9] : memref<38x1xf32, #tpu.memory_space<vmem>>, vector<38x1xf32>
    %cst_10 = arith.constant dense<0.000000e+00> : vector<38x480xf32>
    %10 = tpu.matmul %8, %7, %cst_10 {dimension_numbers = #tpu.dot_dimension_numbers<[1], [0], [0], [1], [0, 0, 1, 1], [], []>} : vector<38x38xf32>, vector<38x480xf32>, vector<38x480xf32> -> vector<38x480xf32>
    %11 = vector.broadcast %9 : vector<38x1xf32> to vector<38x480xf32>
    %12 = arith.addf %10, %11 : vector<38x480xf32>
    %cst_11 = arith.constant 0.000000e+00 : f32
    %13 = vector.broadcast %cst_11 : f32 to vector<38x480xf32>
    %14 = arith.maximumf %12, %13 : vector<38x480xf32>
    %c0_12 = arith.constant 0 : index
    %c0_13 = arith.constant 0 : index
    %15 = vector.load %arg6[%c0_12, %c0_13] : memref<480x32xf32, #tpu.memory_space<vmem>>, vector<480x32xf32>
    %cst_14 = arith.constant dense<0.000000e+00> : vector<38x32xf32>
    %16 = tpu.matmul %14, %15, %cst_14 {dimension_numbers = #tpu.dot_dimension_numbers<[1], [0], [0], [1], [0, 0, 1, 1], [], []>} : vector<38x480xf32>, vector<480x32xf32>, vector<38x32xf32> -> vector<38x32xf32>
    %c0_15 = arith.constant 0 : index
    %c0_16 = arith.constant 0 : index
    %17 = vector.load %arg7[%c0_15, %c0_16] : memref<38x32xf32, #tpu.memory_space<vmem>>, vector<38x32xf32>
    tpu.vector_store %arg7[%c0_15, %c0_16], %16 {strides = array<i32>} : memref<38x32xf32, #tpu.memory_space<vmem>>, vector<38x32xf32>,
    return
  }
  func.func @transform_0(%arg0: i32) -> (i32, i32) {
    %c0_i32 = arith.constant 0 : i32
    %c0_i32_0 = arith.constant 0 : i32
    %c0_i32_1 = arith.constant 0 : i32
    return %c0_i32, %c0_i32_0 : i32, i32
  }
  func.func @transform_1(%arg0: i32) -> (i32, i32) {
    %c0_i32 = arith.constant 0 : i32
    %c0_i32_0 = arith.constant 0 : i32
    %c0_i32_1 = arith.constant 0 : i32
    return %c0_i32, %c0_i32_0 : i32, i32
  }
  func.func @transform_2(%arg0: i32) -> (i32, i32) {
    %c0_i32 = arith.constant 0 : i32
    %c0_i32_0 = arith.constant 0 : i32
    %c0_i32_1 = arith.constant 0 : i32
    return %c0_i32, %c0_i32_0 : i32, i32
  }
  func.func @transform_3(%arg0: i32) -> (i32, i32) {
    %c0_i32 = arith.constant 0 : i32
    %c0_i32_0 = arith.constant 0 : i32
    %c0_i32_1 = arith.constant 0 : i32
    return %c0_i32, %c0_i32_0 : i32, i32
  }
  func.func @transform_4(%arg0: i32) -> (i32, i32) {
    %c0_i32 = arith.constant 0 : i32
    %c0_i32_0 = arith.constant 0 : i32
    %c0_i32_1 = arith.constant 0 : i32
    return %c0_i32, %c0_i32_0 : i32, i32
  }
  func.func @transform_5(%arg0: i32) -> (i32, i32) {
    %c0_i32 = arith.constant 0 : i32
    %c0_i32_0 = arith.constant 0 : i32
    %c0_i32_1 = arith.constant 0 : i32
    return %c0_i32, %c0_i32_0 : i32, i32
  }
  func.func @transform_6(%arg0: i32) -> (i32, i32) {
    %c0_i32 = arith.constant 0 : i32
    %c0_i32_0 = arith.constant 0 : i32
    %c0_i32_1 = arith.constant 0 : i32
    return %c0_i32, %c0_i32_0 : i32, i32
  }
}

module attributes {stable_mosaic.version = 11 : i64} {
  func.func @kernel(%arg0: i32, %arg1: memref<55x32xf32, #tpu.memory_space<vmem>>, %arg2: memref<55x55xf32, #tpu.memory_space<vmem>>, %arg3: memref<55x1xf32, #tpu.memory_space<vmem>>, %arg4: memref<1x55xf32, #tpu.memory_space<vmem>>, %arg5: memref<1x1xf32, #tpu.memory_space<vmem>>, %arg6: memref<1x32xf32, #tpu.memory_space<vmem>>) attributes {dimension_semantics = [#tpu.dimension_semantics<arbitrary>], iteration_bounds = array<i64: 1>, scalar_prefetch = 0 : i64, scratch_operands = 0 : i64, tpu.core_type = #tpu.core_type<tc>, window_params = [{pipeline_mode = #tpu.pipeline_mode<synchronous>, transform_indices = @transform_0, window_bounds = array<i64: 55, 32>}, {pipeline_mode = #tpu.pipeline_mode<synchronous>, transform_indices = @transform_1, window_bounds = array<i64: 55, 55>}, {pipeline_mode = #tpu.pipeline_mode<synchronous>, transform_indices = @transform_2, window_bounds = array<i64: 55, 1>}, {pipeline_mode = #tpu.pipeline_mode<synchronous>, transform_indices = @transform_3, window_bounds = array<i64: 1, 55>}, {pipeline_mode = #tpu.pipeline_mode<synchronous>, transform_indices = @transform_4, window_bounds = array<i64: 1, 1>}, {pipeline_mode = #tpu.pipeline_mode<synchronous>, transform_indices = @transform_5, window_bounds = array<i64: 1, 32>}]} {
    %c0 = arith.constant 0 : index
    %c0_0 = arith.constant 0 : index
    %0 = vector.load %arg1[%c0, %c0_0] : memref<55x32xf32, #tpu.memory_space<vmem>>, vector<55x32xf32>
    %c0_1 = arith.constant 0 : index
    %c0_2 = arith.constant 0 : index
    %1 = vector.load %arg2[%c0_1, %c0_2] : memref<55x55xf32, #tpu.memory_space<vmem>>, vector<55x55xf32>
    %c0_3 = arith.constant 0 : index
    %c0_4 = arith.constant 0 : index
    %2 = vector.load %arg3[%c0_3, %c0_4] : memref<55x1xf32, #tpu.memory_space<vmem>>, vector<55x1xf32>
    %cst = arith.constant dense<0.000000e+00> : vector<55x32xf32>
    %3 = tpu.matmul %1, %0, %cst {dimension_numbers = #tpu.dot_dimension_numbers<[1], [0], [0], [1], [0, 0, 1, 1], [], []>} : vector<55x55xf32>, vector<55x32xf32>, vector<55x32xf32> -> vector<55x32xf32>
    %4 = vector.broadcast %2 : vector<55x1xf32> to vector<55x32xf32>
    %5 = arith.addf %3, %4 : vector<55x32xf32>
    %cst_5 = arith.constant 0.000000e+00 : f32
    %6 = vector.broadcast %cst_5 : f32 to vector<55x32xf32>
    %7 = arith.maximumf %5, %6 : vector<55x32xf32>
    %c0_6 = arith.constant 0 : index
    %c0_7 = arith.constant 0 : index
    %8 = vector.load %arg4[%c0_6, %c0_7] : memref<1x55xf32, #tpu.memory_space<vmem>>, vector<1x55xf32>
    %c0_8 = arith.constant 0 : index
    %c0_9 = arith.constant 0 : index
    %9 = vector.load %arg5[%c0_8, %c0_9] : memref<1x1xf32, #tpu.memory_space<vmem>>, vector<1x1xf32>
    %cst_10 = arith.constant dense<0.000000e+00> : vector<1x32xf32>
    %10 = tpu.matmul %8, %7, %cst_10 {dimension_numbers = #tpu.dot_dimension_numbers<[1], [0], [0], [1], [0, 0, 1, 1], [], []>} : vector<1x55xf32>, vector<55x32xf32>, vector<1x32xf32> -> vector<1x32xf32>
    %11 = vector.broadcast %9 : vector<1x1xf32> to vector<1x32xf32>
    %12 = arith.addf %10, %11 : vector<1x32xf32>
    %c0_11 = arith.constant 0 : index
    %c0_12 = arith.constant 0 : index
    %13 = vector.load %arg6[%c0_11, %c0_12] : memref<1x32xf32, #tpu.memory_space<vmem>>, vector<1x32xf32>
    tpu.vector_store %arg6[%c0_11, %c0_12], %12 {strides = array<i32>} : memref<1x32xf32, #tpu.memory_space<vmem>>, vector<1x32xf32>,
    return
  }
  func.func @transform_0(%arg0: i32) -> (i32, i32) {
    %c0_i32 = arith.constant 0 : i32
    %c0_i32_0 = arith.constant 0 : i32
    %c0_i32_1 = arith.constant 0 : i32
    return %c0_i32, %c0_i32_0 : i32, i32
  }
  func.func @transform_1(%arg0: i32) -> (i32, i32) {
    %c0_i32 = arith.constant 0 : i32
    %c0_i32_0 = arith.constant 0 : i32
    %c0_i32_1 = arith.constant 0 : i32
    return %c0_i32, %c0_i32_0 : i32, i32
  }
  func.func @transform_2(%arg0: i32) -> (i32, i32) {
    %c0_i32 = arith.constant 0 : i32
    %c0_i32_0 = arith.constant 0 : i32
    %c0_i32_1 = arith.constant 0 : i32
    return %c0_i32, %c0_i32_0 : i32, i32
  }
  func.func @transform_3(%arg0: i32) -> (i32, i32) {
    %c0_i32 = arith.constant 0 : i32
    %c0_i32_0 = arith.constant 0 : i32
    %c0_i32_1 = arith.constant 0 : i32
    return %c0_i32, %c0_i32_0 : i32, i32
  }
  func.func @transform_4(%arg0: i32) -> (i32, i32) {
    %c0_i32 = arith.constant 0 : i32
    %c0_i32_0 = arith.constant 0 : i32
    %c0_i32_1 = arith.constant 0 : i32
    return %c0_i32, %c0_i32_0 : i32, i32
  }
  func.func @transform_5(%arg0: i32) -> (i32, i32) {
    %c0_i32 = arith.constant 0 : i32
    %c0_i32_0 = arith.constant 0 : i32
    %c0_i32_1 = arith.constant 0 : i32
    return %c0_i32, %c0_i32_0 : i32, i32
  }
}

</mosaic_0001>

<bundles_post_ra>
// kernel: network_apply.3
= control target key start
LH: loop header
LB: loop body
LE: loop exit
PB: predicated region body
PF: predicated region fallthrough
CT: control target
= control target key end

     0   :  { %vm46_vm0 = vcmask 1045504   ;;  %v403_v3 = vmov 0   ;;  %vm42_vm1 = vcmask 179200   ;;  %vm150_vm2 = vcmask 64512   ;;  %s674_s0 = inlined_call_operand.vmem [shape: f32[22,480], index: 0, kind: input, shape index: {}]   ;;  %s675_s1 = inlined_call_operand.vmem [shape: f32[8,22], index: 1, kind: input, shape index: {}]   ;;  %s676_s2 = inlined_call_operand.vmem [shape: f32[8,1], index: 2, kind: input, shape index: {}]   ;;  %s677_s4 = inlined_call_operand.vmem [shape: f32[8,1], index: 4, kind: input, shape index: {}]   ;;  %s678_s3 = inlined_call_operand.vmem [shape: f32[8,8], index: 3, kind: input, shape index: {}]   ;;  %s679_s5 = inlined_call_operand.vmem [shape: f32[480,32], index: 5, kind: input, shape index: {}]   ;;  %s680_s6 = inlined_call_operand.vmem [shape: f32[8,32], index: 6, kind: output, shape index: {}]  }
   0x1   :  { %v31_v0 = vld [vmem:[%s674_s0 + $0x40] sm:$0x3f]  ;;  %v32_v1 = vld [vmem:[%s674_s0 + $0x48] sm:$0x3f]  ;;  %v33_v2 = vld [vmem:[%s674_s0 + $0x50] sm:$0x3f]  ;;  %402 = vset.pattern.permute.xlu0 %v403_v3 }
   0x2   :  { %388 = vmatpush.msk.msra.mxu0 %vm46_vm0, %v31_v0  ;;  %390 = vmatpush.msk.msra.mxu1 %vm46_vm0, %v32_v1  ;;  %v34_v4 = vld [vmem:[%s674_s0 + $0x58] sm:$0x3f]  ;;  %v27_v5 = vld [vmem:[%s674_s0 + $0x20] sm:$0xff]  ;;  %v28_v6 = vld [vmem:[%s674_s0 + $0x28] sm:$0xff]  ;;  %vm298_vm3 = vcmask 785408   ;;  %vm382_vm4 = vcmask 261120  }
   0x3   :  { %392 = vmatpush.msk.msra.mxu2 %vm46_vm0, %v33_v2  ;;  %394 = vmatpush.msk.msra.mxu3 %vm46_vm0, %v34_v4  ;;  %v29_v7 = vld [vmem:[%s674_s0 + $0x30] sm:$0xff]  ;;  %v30_v8 = vld [vmem:[%s674_s0 + $0x38] sm:$0xff]  ;;  %v23_v9 = vld [vmem:[%s674_s0] sm:$0xff] }
   0x4   :  { %73 = vmatpush.msra.mxu0 %v27_v5  ;;  %93 = vmatpush.msra.mxu1 %v28_v6  ;;  %v24_v10 = vld [vmem:[%s674_s0 + $0x8] sm:$0xff]  ;;  %v25_v11 = vld [vmem:[%s674_s0 + $0x10] sm:$0xff]  ;;  %v26_v12 = vld [vmem:[%s674_s0 + $0x18] sm:$0xff] }
   0x5   :  { %113 = vmatpush.msra.mxu2 %v29_v7  ;;  %133 = vmatpush.msra.mxu3 %v30_v8  ;;  %v35_v13 = vld [vmem:[%s675_s1] sm:$0xff]  ;;  %v253_v24 = vld [vmem:[%s679_s5 + $0x78] sm:$0xff]  ;;  %v252_v26 = vld [vmem:[%s679_s5 + $0x70] sm:$0xff] }
   0x6   :  { %74 = vmatpush.msra.mxu0 %v23_v9  ;;  %94 = vmatpush.msra.mxu1 %v24_v10  ;;  %v36_v14 = vld [vmem:[%s676_s2] sm:$0xff]  ;;  %v269_v25 = vld [vmem:[%s679_s5 + $0xf8] sm:$0xff]  ;;  %v268_v27 = vld [vmem:[%s679_s5 + $0xf0] sm:$0xff] }
   0x7   :  { %114 = vmatpush.msra.mxu2 %v25_v11  ;;  %134 = vmatpush.msra.mxu3 %v26_v12  ;;  %v144_v15 = vld [vmem:[%s677_s4] sm:$0xff]  ;;  %v251_v32 = vld [vmem:[%s679_s5 + $0x68] sm:$0xff]  ;;  %v285_v38 = vld [vmem:[%s679_s5 + $0x178] sm:$0xff] }
   0x8   :  { %389 = vmatmul.msk.f32.vlgmr.msra.gmra.mxu0 %vm42_vm1, %v35_v13  ;;  %391 = vmatmul.msk.f32.vlgmr.msra.gmra.mxu1 %vm42_vm1, %v35_v13  ;;  %v143_v23 = vld [vmem:[%s678_s3] sm:$0xff]  ;;  %v267_v33 = vld [vmem:[%s679_s5 + $0xe8] sm:$0xff]  ;;  %v297_v39 = vld [vmem:[%s679_s5 + $0x1d8] sm:$0xff] }
   0x9   :  { %393 = vmatmul.msk.f32.vlgmr.msra.gmra.mxu2 %vm42_vm1, %v35_v13  ;;  %395 = vmatmul.msk.f32.vlgmr.msra.gmra.mxu3 %vm42_vm1, %v35_v13  ;;  %v250_v36 = vld [vmem:[%s679_s5 + $0x60] sm:$0xff]  ;;  %v249_v40 = vld [vmem:[%s679_s5 + $0x58] sm:$0xff]  ;;  %v284_v42 = vld [vmem:[%s679_s5 + $0x170] sm:$0xff] }
   0xa   :  { %39 = vperm.xlu0 %402, %v36_v14   ;;  %v266_v37 = vld [vmem:[%s679_s5 + $0xe0] sm:$0xff]  ;;  %v265_v41 = vld [vmem:[%s679_s5 + $0xd8] sm:$0xff]  ;;  %v296_v43 = vld [vmem:[%s679_s5 + $0x1d0] sm:$0xff] }
   0xb   :  { %v248_v44 = vld [vmem:[%s679_s5 + $0x50] sm:$0xff]  ;;  %v283_v46 = vld [vmem:[%s679_s5 + $0x168] sm:$0xff]  ;;  %v282_v50 = vld [vmem:[%s679_s5 + $0x160] sm:$0xff] }
   0xc   :  { %v264_v45 = vld [vmem:[%s679_s5 + $0xd0] sm:$0xff]  ;;  %v295_v47 = vld [vmem:[%s679_s5 + $0x1c8] sm:$0xff]  ;;  %v246_v51 = vld [vmem:[%s679_s5 + $0x40] sm:$0xff] }
   0xd   :  { %v247_v48 = vld [vmem:[%s679_s5 + $0x48] sm:$0xff]  ;;  %v262_v52 = vld [vmem:[%s679_s5 + $0xc0] sm:$0xff]  ;;  %v281_v53 = vld [vmem:[%s679_s5 + $0x158] sm:$0xff] }
   0xe   :  { %v263_v49 = vld [vmem:[%s679_s5 + $0xc8] sm:$0xff]  ;;  %v245_v54 = vld [vmem:[%s679_s5 + $0x38] sm:$0xff]  ;;  %v280_v56 = vld [vmem:[%s679_s5 + $0x150] sm:$0xff] }
   0xf   :  { %v261_v55 = vld [vmem:[%s679_s5 + $0xb8] sm:$0xff]  ;;  %v244_v57 = vld [vmem:[%s679_s5 + $0x30] sm:$0xff]  ;;  %v279_v59 = vld [vmem:[%s679_s5 + $0x148] sm:$0xff] }
  0x10   :  { %v260_v58 = vld [vmem:[%s679_s5 + $0xb0] sm:$0xff]  ;;  %v243_v60 = vld [vmem:[%s679_s5 + $0x28] sm:$0xff]  ;;  %v242_v62 = vld [vmem:[%s679_s5 + $0x20] sm:$0xff] }
  0x11   :  { %v259_v61 = vld [vmem:[%s679_s5 + $0xa8] sm:$0xff]  ;;  %v258_v63 = vld [vmem:[%s679_s5 + $0xa0] sm:$0xff]  ;;  %v241_v0 = vld [vmem:[%s679_s5 + $0x18] sm:$0xff] }
  0x12   :  { %147 = vperm.xlu0 %402, %v144_v15   ;;  %v257_v1 = vld [vmem:[%s679_s5 + $0x98] sm:$0xff]  ;;  %v240_v2 = vld [vmem:[%s679_s5 + $0x10] sm:$0xff]  ;;  %v278_v4 = vld [vmem:[%s679_s5 + $0x140] sm:$0xff] }
  0x13   :  { %v256_v3 = vld [vmem:[%s679_s5 + $0x90] sm:$0xff]  ;;  %v294_v5 = vld [vmem:[%s679_s5 + $0x1c0] sm:$0xff]  ;;  %v239_v6 = vld [vmem:[%s679_s5 + $0x8] sm:$0xff] }
  0x14   :  { %v255_v7 = vld [vmem:[%s679_s5 + $0x88] sm:$0xff]  ;;  %v277_v8 = vld [vmem:[%s679_s5 + $0x138] sm:$0xff]  ;;  %v238_v10 = vld [vmem:[%s679_s5] sm:$0xff] }
  0x15   :  { %v293_v9 = vld [vmem:[%s679_s5 + $0x1b8] sm:$0xff]  ;;  %v254_v11 = vld [vmem:[%s679_s5 + $0x80] sm:$0xff]  ;;  %v276_v12 = vld [vmem:[%s679_s5 + $0x130] sm:$0xff] }
  0x16   :  { %v292_v13 = vld [vmem:[%s679_s5 + $0x1b0] sm:$0xff]  ;;  %v275_v14 = vld [vmem:[%s679_s5 + $0x128] sm:$0xff] }
  0x17   :  { %v291_v15 = vld [vmem:[%s679_s5 + $0x1a8] sm:$0xff] }
  0x7c   :  { %v40_v16 = vpop.permute.xlu0 %39 }
  0x85   :  { %v76_v17 = vpop.f32.mrf.mxu0  ;;  %v96_v18 = vpop.f32.mrf.mxu1 }
  0x86   :  { %v77_v19 = vadd.f32 %v76_v17, %v40_v16  ;;  %v97_v20 = vadd.f32 %v96_v18, %v40_v16  ;;  %v290_v17 = vld [vmem:[%s679_s5 + $0x1a0] sm:$0xff]  ;;  %v273_v18 = vld [vmem:[%s679_s5 + $0x118] sm:$0xff] }
  0x88   :  { %v139_v21 = vmax.f32 %v77_v19, 0.0  ;;  %v140_v22 = vmax.f32 %v97_v20, 0.0  ;;  %v289_v19 = vld [vmem:[%s679_s5 + $0x198] sm:$0xff]  ;;  %v272_v20 = vld [vmem:[%s679_s5 + $0x110] sm:$0xff] }
  0x8a   :  { %169 = vmatpush.msrb.mxu0 %v139_v21  ;;  %189 = vmatpush.msrb.mxu1 %v140_v22  ;;  %v288_v21 = vld [vmem:[%s679_s5 + $0x190] sm:$0xff]  ;;  %v271_v22 = vld [vmem:[%s679_s5 + $0x108] sm:$0xff] }
  0x8b   :  { %396 = vmatmul.msk.f32.vlgmr.msrb.gmra.mxu0 %vm150_vm2, %v143_v23  ;;  %397 = vmatmul.msk.f32.vlgmr.msrb.gmra.mxu1 %vm150_vm2, %v143_v23 }
  0x8c   :  { %v116_v28 = vpop.f32.mrf.mxu2  ;;  %v136_v29 = vpop.f32.mrf.mxu3  ;;  %302 = vmatpush.msra.mxu0 %v253_v24  ;;  %322 = vmatpush.msra.mxu1 %v269_v25  ;;  %v270_v24 = vld [vmem:[%s679_s5 + $0x100] sm:$0xff] }
  0x8d   :  { %v117_v30 = vadd.f32 %v116_v28, %v40_v16  ;;  %v137_v31 = vadd.f32 %v136_v29, %v40_v16  ;;  %v274_v16 = vld [vmem:[%s679_s5 + $0x120] sm:$0xff] }
  0x8e   :  { %303 = vmatpush.msra.mxu0 %v252_v26  ;;  %323 = vmatpush.msra.mxu1 %v268_v27  ;;  %v286_v25 = vld [vmem:[%s679_s5 + $0x180] sm:$0xff]  ;;  %v148_v26 = vpop.permute.xlu0 %147 }
  0x8f   :  { %v141_v34 = vmax.f32 %v117_v30, 0.0  ;;  %v142_v35 = vmax.f32 %v137_v31, 0.0 }
  0x90   :  { %304 = vmatpush.msra.mxu0 %v251_v32  ;;  %324 = vmatpush.msra.mxu1 %v267_v33 }
  0x91   :  { %209 = vmatpush.msrb.mxu2 %v141_v34  ;;  %229 = vmatpush.msrb.mxu3 %v142_v35 }
  0x92   :  { %398 = vmatmul.msk.f32.vlgmr.msrb.gmra.mxu2 %vm150_vm2, %v143_v23  ;;  %399 = vmatmul.msk.f32.vlgmr.msrb.gmra.mxu3 %vm150_vm2, %v143_v23  ;;  %v287_v23 = vld [vmem:[%s679_s5 + $0x188] sm:$0xff] }
  0x93   :  { %305 = vmatpush.msra.mxu0 %v250_v36  ;;  %325 = vmatpush.msra.mxu1 %v266_v37 }
  0x94   :  { %342 = vmatpush.msra.mxu2 %v285_v38  ;;  %366 = vmatpush.msra.mxu3 %v297_v39 }
  0x95   :  { %306 = vmatpush.msra.mxu0 %v249_v40  ;;  %326 = vmatpush.msra.mxu1 %v265_v41 }
  0x96   :  { %343 = vmatpush.msra.mxu2 %v284_v42  ;;  %367 = vmatpush.msra.mxu3 %v296_v43 }
  0x97   :  { %307 = vmatpush.msra.mxu0 %v248_v44  ;;  %327 = vmatpush.msra.mxu1 %v264_v45 }
  0x98   :  { %344 = vmatpush.msra.mxu2 %v283_v46  ;;  %368 = vmatpush.msra.mxu3 %v295_v47 }
  0x99   :  { %308 = vmatpush.msra.mxu0 %v247_v48  ;;  %328 = vmatpush.msra.mxu1 %v263_v49 }
  0x9a   :  { %345 = vmatpush.msra.mxu2 %v282_v50  ;;  %369 = vmatpush.msra.mxu3 %v294_v5 }
  0x9b   :  { %309 = vmatpush.msra.mxu0 %v246_v51  ;;  %329 = vmatpush.msra.mxu1 %v262_v52 }
  0x9c   :  { %346 = vmatpush.msra.mxu2 %v281_v53  ;;  %370 = vmatpush.msra.mxu3 %v293_v9 }
  0x9d   :  { %310 = vmatpush.msra.mxu0 %v245_v54  ;;  %330 = vmatpush.msra.mxu1 %v261_v55 }
  0x9e   :  { %347 = vmatpush.msra.mxu2 %v280_v56  ;;  %371 = vmatpush.msra.mxu3 %v292_v13 }
  0x9f   :  { %311 = vmatpush.msra.mxu0 %v244_v57  ;;  %331 = vmatpush.msra.mxu1 %v260_v58 }
  0xa0   :  { %348 = vmatpush.msra.mxu2 %v279_v59  ;;  %372 = vmatpush.msra.mxu3 %v291_v15 }
  0xa1   :  { %312 = vmatpush.msra.mxu0 %v243_v60  ;;  %332 = vmatpush.msra.mxu1 %v259_v61 }
  0xa2   :  { %349 = vmatpush.msra.mxu2 %v278_v4  ;;  %373 = vmatpush.msra.mxu3 %v290_v17 }
  0xa3   :  { %313 = vmatpush.msra.mxu0 %v242_v62  ;;  %333 = vmatpush.msra.mxu1 %v258_v63 }
  0xa4   :  { %350 = vmatpush.msra.mxu2 %v277_v8  ;;  %374 = vmatpush.msra.mxu3 %v289_v19 }
  0xa5   :  { %314 = vmatpush.msra.mxu0 %v241_v0  ;;  %334 = vmatpush.msra.mxu1 %v257_v1 }
  0xa6   :  { %351 = vmatpush.msra.mxu2 %v276_v12  ;;  %375 = vmatpush.msra.mxu3 %v288_v21 }
  0xa7   :  { %315 = vmatpush.msra.mxu0 %v240_v2  ;;  %335 = vmatpush.msra.mxu1 %v256_v3 }
  0xa8   :  { %352 = vmatpush.msra.mxu2 %v275_v14  ;;  %376 = vmatpush.msra.mxu3 %v287_v23 }
  0xa9   :  { %316 = vmatpush.msra.mxu0 %v239_v6  ;;  %336 = vmatpush.msra.mxu1 %v255_v7 }
  0xaa   :  { %353 = vmatpush.msra.mxu2 %v274_v16  ;;  %377 = vmatpush.msra.mxu3 %v286_v25 }
  0xab   :  { %317 = vmatpush.msra.mxu0 %v238_v10  ;;  %337 = vmatpush.msra.mxu1 %v254_v11 }
  0xac   :  { %354 = vmatpush.msra.mxu2 %v273_v18 }
  0xae   :  { %355 = vmatpush.msra.mxu2 %v272_v20 }
  0xb0   :  { %356 = vmatpush.msra.mxu2 %v271_v22 }
  0xb2   :  { %357 = vmatpush.msra.mxu2 %v270_v24 }
 0x108   :  { %v171_v27 = vpop.f32.mrf.mxu0  ;;  %v191_v28 = vpop.f32.mrf.mxu1 }
 0x109   :  { %v172_v29 = vadd.f32 %v171_v27, %v148_v26  ;;  %v192_v30 = vadd.f32 %v191_v28, %v148_v26 }
 0x10b   :  { %v234_v31 = vmax.f32 %v172_v29, 0.0  ;;  %v235_v32 = vmax.f32 %v192_v30, 0.0 }
 0x10d   :  { %318 = vmatmul.f32.vlgmr.msra.gmra.mxu0 %v234_v31  ;;  %338 = vmatmul.f32.vlgmr.msra.gmra.mxu1 %v235_v32 }
 0x115   :  { %v211_v33 = vpop.f32.mrf.mxu2  ;;  %v231_v34 = vpop.f32.mrf.mxu3 }
 0x116   :  { %v212_v35 = vadd.f32 %v211_v33, %v148_v26  ;;  %v232_v36 = vadd.f32 %v231_v34, %v148_v26 }
 0x118   :  { %v236_v37 = vmax.f32 %v212_v35, 0.0  ;;  %v237_v38 = vmax.f32 %v232_v36, 0.0 }
 0x11a   :  { %358 = vmatmul.f32.vlgmr.msra.gmra.mxu2 %v236_v37  ;;  %400 = vmatmul.msk.f32.vlgmr.msra.gmra.mxu3 %vm298_vm3, %v237_v38 }
 0x18a   :  { %v319_v39 = vpop.f32.mrf.mxu0  ;;  %v339_v40 = vpop.f32.mrf.mxu1 }
 0x18b   :  { %v340_v41 = vadd.f32 %v339_v40, %v319_v39 }
 0x19d   :  { %v359_v42 = vpop.f32.mrf.mxu2  ;;  %v379_v44 = vpop.f32.mrf.mxu3 }
 0x19e   :  { %v360_v43 = vadd.f32 %v359_v42, %v340_v41 }
 0x1a0   :  { %v380_v45 = vadd.f32 %v379_v44, %v360_v43 }
 0x1a2   :  { %383 = vst.msk [vmem:[%s680_s6] sm:$0xff] %vm382_vm4, %v380_v45 }

// kernel: network_apply.4
= control target key start
LH: loop header
LB: loop body
LE: loop exit
PB: predicated region body
PF: predicated region fallthrough
CT: control target
= control target key end

     0   :  { %vm94_vm0 = vcmask 1045504   ;;  %v737_v3 = vmov 0   ;;  %vm78_vm1 = vcmask 310272   ;;  %vm525_vm2 = vcmask 785408   ;;  %s1151_s0 = inlined_call_operand.vmem [shape: f32[38,480], index: 0, kind: input, shape index: {}]   ;;  %s1152_s1 = inlined_call_operand.vmem [shape: f32[38,38], index: 1, kind: input, shape index: {}]   ;;  %s1153_s2 = inlined_call_operand.vmem [shape: f32[38,1], index: 2, kind: input, shape index: {}]   ;;  %s1154_s4 = inlined_call_operand.vmem [shape: f32[38,1], index: 4, kind: input, shape index: {}]   ;;  %s1155_s3 = inlined_call_operand.vmem [shape: f32[38,38], index: 3, kind: input, shape index: {}]   ;;  %s1156_s5 = inlined_call_operand.vmem [shape: f32[480,32], index: 5, kind: input, shape index: {}]   ;;  %s1157_s6 = inlined_call_operand.vmem [shape: f32[38,32], index: 6, kind: output, shape index: {}]  }
   0x1   :  { %v39_v0 = vld [vmem:[%s1151_s0 + $0x80] sm:$0x3f]  ;;  %v40_v1 = vld [vmem:[%s1151_s0 + $0x88] sm:$0x3f]  ;;  %v41_v2 = vld [vmem:[%s1151_s0 + $0x90] sm:$0x3f]  ;;  %735 = vset.pattern.permute.xlu1 %v737_v3  ;;  %734 = vset.pattern.permute.xlu0 %v737_v3 }
   0x2   :  { %680 = vmatpush.msk.msra.mxu0 %vm94_vm0, %v39_v0  ;;  %686 = vmatpush.msk.msra.mxu1 %vm94_vm0, %v40_v1  ;;  %v42_v4 = vld [vmem:[%s1151_s0 + $0x98] sm:$0x3f]  ;;  %v35_v5 = vld [vmem:[%s1151_s0 + $0x60] sm:$0xff]  ;;  %v36_v6 = vld [vmem:[%s1151_s0 + $0x68] sm:$0xff]  ;;  %vm669_vm3 = vcmask 261120   ;;  %vm674_vm4 = vcmask 259072  }
   0x3   :  { %692 = vmatpush.msk.msra.mxu2 %vm94_vm0, %v41_v2  ;;  %698 = vmatpush.msk.msra.mxu3 %vm94_vm0, %v42_v4  ;;  %v37_v7 = vld [vmem:[%s1151_s0 + $0x70] sm:$0xff]  ;;  %v38_v8 = vld [vmem:[%s1151_s0 + $0x78] sm:$0xff]  ;;  %v31_v9 = vld [vmem:[%s1151_s0 + $0x40] sm:$0xff] }
   0x4   :  { %119 = vmatpush.msra.mxu0 %v35_v5  ;;  %151 = vmatpush.msra.mxu1 %v36_v6  ;;  %v32_v10 = vld [vmem:[%s1151_s0 + $0x48] sm:$0xff]  ;;  %v33_v11 = vld [vmem:[%s1151_s0 + $0x50] sm:$0xff]  ;;  %v34_v12 = vld [vmem:[%s1151_s0 + $0x58] sm:$0xff] }
   0x5   :  { %183 = vmatpush.msra.mxu2 %v37_v7  ;;  %215 = vmatpush.msra.mxu3 %v38_v8  ;;  %v27_v13 = vld [vmem:[%s1151_s0 + $0x20] sm:$0xff]  ;;  %v28_v14 = vld [vmem:[%s1151_s0 + $0x28] sm:$0xff]  ;;  %v29_v15 = vld [vmem:[%s1151_s0 + $0x30] sm:$0xff] }
   0x6   :  { %120 = vmatpush.msra.mxu0 %v31_v9  ;;  %152 = vmatpush.msra.mxu1 %v32_v10  ;;  %v30_v16 = vld [vmem:[%s1151_s0 + $0x38] sm:$0xff]  ;;  %v23_v17 = vld [vmem:[%s1151_s0] sm:$0xff]  ;;  %v24_v18 = vld [vmem:[%s1151_s0 + $0x8] sm:$0xff] }
   0x7   :  { %184 = vmatpush.msra.mxu2 %v33_v11  ;;  %216 = vmatpush.msra.mxu3 %v34_v12  ;;  %v25_v19 = vld [vmem:[%s1151_s0 + $0x10] sm:$0xff]  ;;  %v26_v20 = vld [vmem:[%s1151_s0 + $0x18] sm:$0xff]  ;;  %v43_v21 = vld [vmem:[%s1152_s1] sm:$0xff] }
   0x8   :  { %121 = vmatpush.msra.mxu0 %v27_v13  ;;  %153 = vmatpush.msra.mxu1 %v28_v14  ;;  %v50_v22 = vld [vmem:[%s1153_s2 + $0x10] sm:$0xff]  ;;  %v52_v23 = vld [vmem:[%s1153_s2 + $0x20] sm:$0x3f]  ;;  %v44_v25 = vld [vmem:[%s1152_s1 + $0x8] sm:$0xff] }
   0x9   :  { %185 = vmatpush.msra.mxu2 %v29_v15  ;;  %217 = vmatpush.msra.mxu3 %v30_v16  ;;  %v48_v24 = vld [vmem:[%s1153_s2] sm:$0xff]  ;;  %v49_v26 = vld [vmem:[%s1153_s2 + $0x8] sm:$0xff]  ;;  %v51_v27 = vld [vmem:[%s1153_s2 + $0x18] sm:$0xff] }
   0xa   :  { %122 = vmatpush.msra.mxu0 %v23_v17  ;;  %154 = vmatpush.msra.mxu1 %v24_v18  ;;  %v260_v28 = vld [vmem:[%s1154_s4] sm:$0xff]  ;;  %v45_v29 = vld [vmem:[%s1152_s1 + $0x10] sm:$0xff]  ;;  %v261_v30 = vld [vmem:[%s1154_s4 + $0x8] sm:$0xff] }
   0xb   :  { %186 = vmatpush.msra.mxu2 %v25_v19  ;;  %218 = vmatpush.msra.mxu3 %v26_v20  ;;  %v262_v31 = vld [vmem:[%s1154_s4 + $0x10] sm:$0xff]  ;;  %v263_v32 = vld [vmem:[%s1154_s4 + $0x18] sm:$0xff]  ;;  %v264_v34 = vld [vmem:[%s1154_s4 + $0x20] sm:$0x3f] }
   0xc   :  { %681 = vmatmul.msk.f32.vlgmr.msra.gmra.mxu0 %vm78_vm1, %v43_v21  ;;  %687 = vmatmul.msk.f32.vlgmr.msra.gmra.mxu1 %vm78_vm1, %v43_v21  ;;  %v46_v33 = vld [vmem:[%s1152_s1 + $0x18] sm:$0xff]  ;;  %v47_v35 = vld [vmem:[%s1152_s1 + $0x20] sm:$0x3f] }
   0xd   :  { %693 = vmatmul.msk.f32.vlgmr.msra.gmra.mxu2 %vm78_vm1, %v43_v21  ;;  %699 = vmatmul.msk.f32.vlgmr.msra.gmra.mxu3 %vm78_vm1, %v43_v21 }
   0xe   :  { %65 = vperm.xlu1 %735, %v50_v22   ;;  %75 = vperm.xlu0 %734, %v52_v23  }
   0xf   :  { %736 = vset.pattern.permute.xlu2 %v737_v3 }
  0x10   :  { %55 = vperm.xlu2 %736, %v48_v24  }
  0x14   :  { %682 = vmatmul.msk.f32.gmra.mxu0 %vm78_vm1, %v44_v25  ;;  %688 = vmatmul.msk.f32.gmra.mxu1 %vm78_vm1, %v44_v25 }
  0x15   :  { %694 = vmatmul.msk.f32.gmra.mxu2 %vm78_vm1, %v44_v25  ;;  %700 = vmatmul.msk.f32.gmra.mxu3 %vm78_vm1, %v44_v25 }
  0x16   :  { %60 = vperm.xlu1 %735, %v49_v26   ;;  %70 = vperm.xlu0 %734, %v51_v27  }
  0x18   :  { %267 = vperm.xlu2 %736, %v260_v28  }
  0x1c   :  { %683 = vmatmul.msk.f32.gmra.mxu0 %vm78_vm1, %v45_v29  ;;  %689 = vmatmul.msk.f32.gmra.mxu1 %vm78_vm1, %v45_v29 }
  0x1d   :  { %695 = vmatmul.msk.f32.gmra.mxu2 %vm78_vm1, %v45_v29  ;;  %701 = vmatmul.msk.f32.gmra.mxu3 %vm78_vm1, %v45_v29  ;;  %v255_v29 = vld [vmem:[%s1155_s3] sm:$0xff] }
  0x1e   :  { %272 = vperm.xlu0 %734, %v261_v30   ;;  %277 = vperm.xlu1 %735, %v262_v31  }
  0x20   :  { %282 = vperm.xlu2 %736, %v263_v32  }
  0x24   :  { %684 = vmatmul.msk.f32.gmra.mxu0 %vm78_vm1, %v46_v33  ;;  %690 = vmatmul.msk.f32.gmra.mxu1 %vm78_vm1, %v46_v33 }
  0x25   :  { %696 = vmatmul.msk.f32.gmra.mxu2 %vm78_vm1, %v46_v33  ;;  %702 = vmatmul.msk.f32.gmra.mxu3 %vm78_vm1, %v46_v33 }
  0x26   :  { %287 = vperm.xlu0 %734, %v264_v34  }
  0x2c   :  { %685 = vmatmul.msk.f32.gmra.mxu0 %vm78_vm1, %v47_v35  ;;  %691 = vmatmul.msk.f32.gmra.mxu1 %vm78_vm1, %v47_v35 }
  0x2d   :  { %697 = vmatmul.msk.f32.gmra.mxu2 %vm78_vm1, %v47_v35  ;;  %703 = vmatmul.msk.f32.gmra.mxu3 %vm78_vm1, %v47_v35 }
  0x6a   :  { %v56_v6 = vpop.permute.xlu2 %55 }
  0x80   :  { %v76_v46 = vpop.permute.xlu0 %75  ;;  %v66_v51 = vpop.permute.xlu1 %65 }
  0x88   :  { %v71_v52 = vpop.permute.xlu0 %70  ;;  %v61_v1 = vpop.permute.xlu1 %60 }
  0x89   :  { %v124_v36 = vpop.f32.mrf.mxu0  ;;  %v156_v37 = vpop.f32.mrf.mxu1 }
  0x8a   :  { %v125_v11 = vadd.f32 %v124_v36, %v56_v6  ;;  %v157_v12 = vadd.f32 %v156_v37, %v56_v6 }
  0x8c   :  { %v235_v23 = vmax.f32 %v125_v11, 0.0  ;;  %v236_v24 = vmax.f32 %v157_v12, 0.0  ;;  %v259_v11 = vld [vmem:[%s1155_s3 + $0x20] sm:$0x3f]  ;;  %v484_v12 = vld [vmem:[%s1156_s5 + $0x98] sm:$0xff] }
  0x90   :  { %v902_v38 = vpop.f32.mrf.mxu2  ;;  %v904_v39 = vpop.f32.mrf.mxu3 }
  0x91   :  { %v127_v40 = vpop.f32.mrf.mxu0  ;;  %v159_v41 = vpop.f32.mrf.mxu1  ;;  %v189_v30 = vadd.f32 %v902_v38, %v56_v6  ;;  %v221_v31 = vadd.f32 %v904_v39, %v56_v6  ;;  %v256_v38 = vld [vmem:[%s1155_s3 + $0x8] sm:$0xff]  ;;  %v480_v39 = vld [vmem:[%s1156_s5 + $0x78] sm:$0xff] }
  0x92   :  { %v128_v4 = vadd.f32 %v127_v40, %v61_v1  ;;  %v160_v5 = vadd.f32 %v159_v41, %v61_v1  ;;  %v496_v40 = vld [vmem:[%s1156_s5 + $0xf8] sm:$0xff]  ;;  %v479_v41 = vld [vmem:[%s1156_s5 + $0x70] sm:$0xff] }
  0x93   :  { %v237_v36 = vmax.f32 %v189_v30, 0.0  ;;  %v238_v37 = vmax.f32 %v221_v31, 0.0  ;;  %v508_v6 = vld [vmem:[%s1156_s5 + $0x158] sm:$0xff] }
  0x94   :  { %v239_v17 = vmax.f32 %v128_v4, 0.0  ;;  %v240_v18 = vmax.f32 %v160_v5, 0.0  ;;  %v470_v4 = vld [vmem:[%s1156_s5 + $0x28] sm:$0xff]  ;;  %v500_v30 = vld [vmem:[%s1156_s5 + $0x118] sm:$0xff] }
  0x95   :  { %v486_v5 = vld [vmem:[%s1156_s5 + $0xa8] sm:$0xff]  ;;  %v516_v31 = vld [vmem:[%s1156_s5 + $0x198] sm:$0xff] }
  0x98   :  { %v191_v42 = vpop.f32.mrf.mxu2  ;;  %v223_v43 = vpop.f32.mrf.mxu3 }
  0x99   :  { %v130_v44 = vpop.f32.mrf.mxu0  ;;  %v162_v45 = vpop.f32.mrf.mxu1  ;;  %v192_v25 = vadd.f32 %v191_v42, %v61_v1  ;;  %v224_v26 = vadd.f32 %v223_v43, %v61_v1  ;;  %v495_v42 = vld [vmem:[%s1156_s5 + $0xf0] sm:$0xff]  ;;  %v478_v43 = vld [vmem:[%s1156_s5 + $0x68] sm:$0xff] }
  0x9a   :  { %v131_v61 = vadd.f32 %v130_v44, %v66_v51  ;;  %v163_v62 = vadd.f32 %v162_v45, %v66_v51  ;;  %v494_v44 = vld [vmem:[%s1156_s5 + $0xe8] sm:$0xff]  ;;  %v477_v45 = vld [vmem:[%s1156_s5 + $0x60] sm:$0xff]  ;;  %v487_v1 = vld [vmem:[%s1156_s5 + $0xb0] sm:$0xff] }
  0x9b   :  { %v241_v34 = vmax.f32 %v192_v25, 0.0  ;;  %v242_v35 = vmax.f32 %v224_v26, 0.0  ;;  %v519_v25 = vld [vmem:[%s1156_s5 + $0x1b0] sm:$0xff]  ;;  %v502_v26 = vld [vmem:[%s1156_s5 + $0x128] sm:$0xff] }
  0x9c   :  { %v243_v7 = vmax.f32 %v131_v61, 0.0  ;;  %v244_v8 = vmax.f32 %v163_v62, 0.0  ;;  %v472_v61 = vld [vmem:[%s1156_s5 + $0x38] sm:$0xff] }
  0x9d   :  { %v488_v62 = vld [vmem:[%s1156_s5 + $0xb8] sm:$0xff] }
  0xa0   :  { %v194_v47 = vpop.f32.mrf.mxu2  ;;  %v226_v48 = vpop.f32.mrf.mxu3 }
  0xa1   :  { %v133_v49 = vpop.f32.mrf.mxu0  ;;  %v165_v50 = vpop.f32.mrf.mxu1  ;;  %v195_v19 = vadd.f32 %v194_v47, %v66_v51  ;;  %v227_v20 = vadd.f32 %v226_v48, %v66_v51  ;;  %v512_v47 = vld [vmem:[%s1156_s5 + $0x178] sm:$0xff]  ;;  %v475_v51 = vld [vmem:[%s1156_s5 + $0x50] sm:$0xff] }
  0xa2   :  { %v134_v57 = vadd.f32 %v133_v49, %v71_v52  ;;  %v166_v58 = vadd.f32 %v165_v50, %v71_v52  ;;  %v476_v48 = vld [vmem:[%s1156_s5 + $0x58] sm:$0xff]  ;;  %v257_v50 = vld [vmem:[%s1155_s3 + $0x10] sm:$0xff] }
  0xa3   :  { %v245_v32 = vmax.f32 %v195_v19, 0.0  ;;  %v246_v33 = vmax.f32 %v227_v20, 0.0  ;;  %v492_v49 = vld [vmem:[%s1156_s5 + $0xd8] sm:$0xff]  ;;  %v482_v19 = vld [vmem:[%s1156_s5 + $0x88] sm:$0xff] }
  0xa4   :  { %v247_v2 = vmax.f32 %v134_v57, 0.0  ;;  %v248_v3 = vmax.f32 %v166_v58, 0.0  ;;  %v510_v57 = vld [vmem:[%s1156_s5 + $0x168] sm:$0xff]  ;;  %v523_v58 = vld [vmem:[%s1156_s5 + $0x1d0] sm:$0xff]  ;;  %v504_v20 = vld [vmem:[%s1156_s5 + $0x138] sm:$0xff] }
  0xa8   :  { %v197_v53 = vpop.f32.mrf.mxu2  ;;  %v229_v54 = vpop.f32.mrf.mxu3 }
  0xa9   :  { %v136_v55 = vpop.f32.mrf.mxu0  ;;  %v168_v56 = vpop.f32.mrf.mxu1  ;;  %v198_v13 = vadd.f32 %v197_v53, %v71_v52  ;;  %v230_v14 = vadd.f32 %v229_v54, %v71_v52  ;;  %v491_v52 = vld [vmem:[%s1156_s5 + $0xd0] sm:$0xff]  ;;  %v524_v54 = vld [vmem:[%s1156_s5 + $0x1d8] sm:$0xff] }
  0xaa   :  { %v137_v59 = vadd.f32 %v136_v55, %v76_v46  ;;  %v169_v60 = vadd.f32 %v168_v56, %v76_v46  ;;  %v511_v53 = vld [vmem:[%s1156_s5 + $0x170] sm:$0xff]  ;;  %v474_v55 = vld [vmem:[%s1156_s5 + $0x48] sm:$0xff] }
  0xab   :  { %v249_v27 = vmax.f32 %v198_v13, 0.0  ;;  %v250_v28 = vmax.f32 %v230_v14, 0.0  ;;  %v490_v56 = vld [vmem:[%s1156_s5 + $0xc8] sm:$0xff]  ;;  %v467_v14 = vld [vmem:[%s1156_s5 + $0x10] sm:$0xff] }
  0xac   :  { %v251_v63 = vmax.f32 %v137_v59, 0.0  ;;  %v252_v0 = vmax.f32 %v169_v60, 0.0  ;;  %v473_v59 = vld [vmem:[%s1156_s5 + $0x40] sm:$0xff]  ;;  %v506_v13 = vld [vmem:[%s1156_s5 + $0x148] sm:$0xff] }
  0xad   :  { %v489_v60 = vld [vmem:[%s1156_s5 + $0xc0] sm:$0xff] }
  0xae   :  { %704 = vmatpush.msk.msrb.mxu0 %vm94_vm0, %v251_v63  ;;  %710 = vmatpush.msk.msrb.mxu1 %vm94_vm0, %v252_v0  ;;  %v258_v63 = vld [vmem:[%s1155_s3 + $0x18] sm:$0xff]  ;;  %v471_v0 = vld [vmem:[%s1156_s5 + $0x30] sm:$0xff] }
  0xb0   :  { %v200_v9 = vpop.f32.mrf.mxu2  ;;  %v232_v10 = vpop.f32.mrf.mxu3  ;;  %329 = vmatpush.msrb.mxu0 %v247_v2  ;;  %361 = vmatpush.msrb.mxu1 %v248_v3  ;;  %v509_v2 = vld [vmem:[%s1156_s5 + $0x160] sm:$0xff]  ;;  %v522_v3 = vld [vmem:[%s1156_s5 + $0x1c8] sm:$0xff] }
  0xb1   :  { %v201_v15 = vadd.f32 %v200_v9, %v76_v46  ;;  %v233_v16 = vadd.f32 %v232_v10, %v76_v46  ;;  %v493_v46 = vld [vmem:[%s1156_s5 + $0xe0] sm:$0xff]  ;;  %v507_v9 = vld [vmem:[%s1156_s5 + $0x150] sm:$0xff]  ;;  %v468_v10 = vld [vmem:[%s1156_s5 + $0x18] sm:$0xff] }
  0xb2   :  { %330 = vmatpush.msrb.mxu0 %v243_v7  ;;  %362 = vmatpush.msrb.mxu1 %v244_v8  ;;  %v469_v7 = vld [vmem:[%s1156_s5 + $0x20] sm:$0xff] }
  0xb3   :  { %v253_v21 = vmax.f32 %v201_v15, 0.0  ;;  %v254_v22 = vmax.f32 %v233_v16, 0.0  ;;  %v485_v8 = vld [vmem:[%s1156_s5 + $0xa0] sm:$0xff]  ;;  %v483_v15 = vld [vmem:[%s1156_s5 + $0x90] sm:$0xff] }
  0xb4   :  { %331 = vmatpush.msrb.mxu0 %v239_v17  ;;  %363 = vmatpush.msrb.mxu1 %v240_v18  ;;  %v505_v16 = vld [vmem:[%s1156_s5 + $0x140] sm:$0xff]  ;;  %v466_v18 = vld [vmem:[%s1156_s5 + $0x8] sm:$0xff] }
  0xb5   :  { %716 = vmatpush.msk.msrb.mxu2 %vm94_vm0, %v253_v21  ;;  %722 = vmatpush.msk.msrb.mxu3 %vm94_vm0, %v254_v22  ;;  %v521_v17 = vld [vmem:[%s1156_s5 + $0x1c0] sm:$0xff]  ;;  %v520_v21 = vld [vmem:[%s1156_s5 + $0x1b8] sm:$0xff] }
  0xb6   :  { %332 = vmatpush.msrb.mxu0 %v235_v23  ;;  %364 = vmatpush.msrb.mxu1 %v236_v24  ;;  %v465_v22 = vld [vmem:[%s1156_s5] sm:$0xff]  ;;  %v503_v24 = vld [vmem:[%s1156_s5 + $0x130] sm:$0xff] }
  0xb7   :  { %393 = vmatpush.msrb.mxu2 %v249_v27  ;;  %425 = vmatpush.msrb.mxu3 %v250_v28  ;;  %v481_v23 = vld [vmem:[%s1156_s5 + $0x80] sm:$0xff]  ;;  %v518_v27 = vld [vmem:[%s1156_s5 + $0x1a8] sm:$0xff] }
  0xb8   :  { %705 = vmatmul.msk.f32.vlgmr.msrb.gmra.mxu0 %vm78_vm1, %v255_v29  ;;  %711 = vmatmul.msk.f32.vlgmr.msrb.gmra.mxu1 %vm78_vm1, %v255_v29  ;;  %v501_v28 = vld [vmem:[%s1156_s5 + $0x120] sm:$0xff] }
  0xb9   :  { %394 = vmatpush.msrb.mxu2 %v245_v32  ;;  %426 = vmatpush.msrb.mxu3 %v246_v33  ;;  %v499_v32 = vld [vmem:[%s1156_s5 + $0x110] sm:$0xff] }
  0xba   :  { %541 = vmatpush.msra.mxu0 %v480_v39  ;;  %573 = vmatpush.msra.mxu1 %v496_v40  ;;  %v515_v33 = vld [vmem:[%s1156_s5 + $0x190] sm:$0xff] }
  0xbb   :  { %395 = vmatpush.msrb.mxu2 %v241_v34  ;;  %427 = vmatpush.msrb.mxu3 %v242_v35  ;;  %v498_v34 = vld [vmem:[%s1156_s5 + $0x108] sm:$0xff] }
  0xbc   :  { %542 = vmatpush.msra.mxu0 %v479_v41  ;;  %574 = vmatpush.msra.mxu1 %v495_v42  ;;  %v514_v35 = vld [vmem:[%s1156_s5 + $0x188] sm:$0xff] }
  0xbd   :  { %396 = vmatpush.msrb.mxu2 %v237_v36  ;;  %428 = vmatpush.msrb.mxu3 %v238_v37  ;;  %v497_v36 = vld [vmem:[%s1156_s5 + $0x100] sm:$0xff] }
  0xbe   :  { %717 = vmatmul.msk.f32.vlgmr.msrb.gmra.mxu2 %vm78_vm1, %v255_v29  ;;  %723 = vmatmul.msk.f32.vlgmr.msrb.gmra.mxu3 %vm78_vm1, %v255_v29  ;;  %v517_v29 = vld [vmem:[%s1156_s5 + $0x1a0] sm:$0xff] }
  0xbf   :  { %543 = vmatpush.msra.mxu0 %v478_v43  ;;  %575 = vmatpush.msra.mxu1 %v494_v44  ;;  %v513_v37 = vld [vmem:[%s1156_s5 + $0x180] sm:$0xff] }
  0xc0   :  { %706 = vmatmul.msk.f32.gmra.mxu0 %vm78_vm1, %v256_v38  ;;  %712 = vmatmul.msk.f32.gmra.mxu1 %vm78_vm1, %v256_v38 }
  0xc1   :  { %605 = vmatpush.msra.mxu2 %v512_v47  ;;  %544 = vmatpush.msra.mxu0 %v477_v45  ;;  %v273_v45 = vpop.permute.xlu0 %272 }
  0xc2   :  { %576 = vmatpush.msra.mxu1 %v493_v46  ;;  %641 = vmatpush.msra.mxu3 %v524_v54 }
  0xc3   :  { %545 = vmatpush.msra.mxu0 %v476_v48  ;;  %606 = vmatpush.msra.mxu2 %v511_v53 }
  0xc4   :  { %577 = vmatpush.msra.mxu1 %v492_v49  ;;  %642 = vmatpush.msra.mxu3 %v523_v58 }
  0xc5   :  { %546 = vmatpush.msra.mxu0 %v475_v51  ;;  %607 = vmatpush.msra.mxu2 %v510_v57 }
  0xc6   :  { %718 = vmatmul.msk.f32.gmra.mxu2 %vm78_vm1, %v256_v38  ;;  %724 = vmatmul.msk.f32.gmra.mxu3 %vm78_vm1, %v256_v38  ;;  %v268_v38 = vpop.permute.xlu2 %267 }
  0xc7   :  { %578 = vmatpush.msra.mxu1 %v491_v52  ;;  %547 = vmatpush.msra.mxu0 %v474_v55 }
  0xc8   :  { %707 = vmatmul.msk.f32.gmra.mxu0 %vm78_vm1, %v257_v50  ;;  %713 = vmatmul.msk.f32.gmra.mxu1 %vm78_vm1, %v257_v50 }
  0xc9   :  { %579 = vmatpush.msra.mxu1 %v490_v56  ;;  %548 = vmatpush.msra.mxu0 %v473_v59  ;;  %v278_v56 = vpop.permute.xlu1 %277 }
  0xca   :  { %608 = vmatpush.msra.mxu2 %v509_v2  ;;  %643 = vmatpush.msra.mxu3 %v522_v3 }
  0xcb   :  { %580 = vmatpush.msra.mxu1 %v489_v60  ;;  %549 = vmatpush.msra.mxu0 %v472_v61 }
  0xcc   :  { %609 = vmatpush.msra.mxu2 %v508_v6  ;;  %644 = vmatpush.msra.mxu3 %v521_v17 }
  0xcd   :  { %581 = vmatpush.msra.mxu1 %v488_v62  ;;  %550 = vmatpush.msra.mxu0 %v471_v0 }
  0xce   :  { %719 = vmatmul.msk.f32.gmra.mxu2 %vm78_vm1, %v257_v50  ;;  %725 = vmatmul.msk.f32.gmra.mxu3 %vm78_vm1, %v257_v50 }
  0xcf   :  { %582 = vmatpush.msra.mxu1 %v487_v1  ;;  %551 = vmatpush.msra.mxu0 %v470_v4 }
  0xd0   :  { %708 = vmatmul.msk.f32.gmra.mxu0 %vm78_vm1, %v258_v63  ;;  %714 = vmatmul.msk.f32.gmra.mxu1 %vm78_vm1, %v258_v63 }
  0xd1   :  { %583 = vmatpush.msra.mxu1 %v486_v5  ;;  %552 = vmatpush.msra.mxu0 %v469_v7  ;;  %v283_v5 = vpop.permute.xlu2 %282 }
  0xd2   :  { %610 = vmatpush.msra.mxu2 %v507_v9  ;;  %645 = vmatpush.msra.mxu3 %v520_v21 }
  0xd3   :  { %584 = vmatpush.msra.mxu1 %v485_v8  ;;  %553 = vmatpush.msra.mxu0 %v468_v10 }
  0xd4   :  { %611 = vmatpush.msra.mxu2 %v506_v13  ;;  %646 = vmatpush.msra.mxu3 %v519_v25 }
  0xd5   :  { %585 = vmatpush.msra.mxu1 %v484_v12  ;;  %554 = vmatpush.msra.mxu0 %v467_v14 }
  0xd6   :  { %720 = vmatmul.msk.f32.gmra.mxu2 %vm78_vm1, %v258_v63  ;;  %726 = vmatmul.msk.f32.gmra.mxu3 %vm78_vm1, %v258_v63 }
  0xd7   :  { %586 = vmatpush.msra.mxu1 %v483_v15  ;;  %612 = vmatpush.msra.mxu2 %v505_v16 }
  0xd8   :  { %709 = vmatmul.msk.f32.gmra.mxu0 %vm78_vm1, %v259_v11  ;;  %715 = vmatmul.msk.f32.gmra.mxu1 %vm78_vm1, %v259_v11 }
  0xd9   :  { %555 = vmatpush.msra.mxu0 %v466_v18  ;;  %587 = vmatpush.msra.mxu1 %v482_v19  ;;  %v288_v18 = vpop.permute.xlu0 %287 }
  0xda   :  { %613 = vmatpush.msra.mxu2 %v504_v20  ;;  %647 = vmatpush.msra.mxu3 %v518_v27 }
  0xdb   :  { %556 = vmatpush.msra.mxu0 %v465_v22  ;;  %588 = vmatpush.msra.mxu1 %v481_v23 }
  0xdc   :  { %614 = vmatpush.msra.mxu2 %v503_v24  ;;  %648 = vmatpush.msra.mxu3 %v517_v29 }
  0xde   :  { %721 = vmatmul.msk.f32.gmra.mxu2 %vm78_vm1, %v259_v11  ;;  %727 = vmatmul.msk.f32.gmra.mxu3 %vm78_vm1, %v259_v11 }
  0xdf   :  { %615 = vmatpush.msra.mxu2 %v502_v26  ;;  %649 = vmatpush.msra.mxu3 %v516_v31 }
  0xe1   :  { %616 = vmatpush.msra.mxu2 %v501_v28  ;;  %650 = vmatpush.msra.mxu3 %v515_v33 }
  0xe3   :  { %617 = vmatpush.msra.mxu2 %v500_v30  ;;  %651 = vmatpush.msra.mxu3 %v514_v35 }
  0xe5   :  { %618 = vmatpush.msra.mxu2 %v499_v32  ;;  %652 = vmatpush.msra.mxu3 %v513_v37 }
  0xe7   :  { %619 = vmatpush.msra.mxu2 %v498_v34 }
  0xe9   :  { %620 = vmatpush.msra.mxu2 %v497_v36 }
 0x135   :  { %v334_v39 = vpop.f32.mrf.mxu0  ;;  %v366_v40 = vpop.f32.mrf.mxu1 }
 0x136   :  { %v335_v41 = vadd.f32 %v334_v39, %v268_v38  ;;  %v367_v42 = vadd.f32 %v366_v40, %v268_v38 }
 0x138   :  { %v445_v43 = vmax.f32 %v335_v41, 0.0  ;;  %v446_v44 = vmax.f32 %v367_v42, 0.0 }
 0x13a   :  { %557 = vmatmul.f32.vlgmr.msra.gmra.mxu0 %v445_v43  ;;  %589 = vmatmul.f32.vlgmr.msra.gmra.mxu1 %v446_v44 }
 0x13d   :  { %v337_v46 = vpop.f32.mrf.mxu0  ;;  %v369_v47 = vpop.f32.mrf.mxu1 }
 0x13e   :  { %v338_v48 = vadd.f32 %v337_v46, %v273_v45  ;;  %v370_v49 = vadd.f32 %v369_v47, %v273_v45 }
 0x140   :  { %v449_v50 = vmax.f32 %v338_v48, 0.0  ;;  %v450_v51 = vmax.f32 %v370_v49, 0.0 }
 0x141   :  { %v398_v52 = vpop.f32.mrf.mxu2  ;;  %v430_v53 = vpop.f32.mrf.mxu3 }
 0x142   :  { %v399_v54 = vadd.f32 %v398_v52, %v268_v38  ;;  %v431_v55 = vadd.f32 %v430_v53, %v268_v38  ;;  %560 = vmatmul.f32.gmra.mxu0 %v449_v50  ;;  %592 = vmatmul.f32.gmra.mxu1 %v450_v51 }
 0x144   :  { %v447_v57 = vmax.f32 %v399_v54, 0.0  ;;  %v448_v58 = vmax.f32 %v431_v55, 0.0 }
 0x145   :  { %v340_v59 = vpop.f32.mrf.mxu0  ;;  %v372_v60 = vpop.f32.mrf.mxu1 }
 0x146   :  { %v341_v61 = vadd.f32 %v340_v59, %v278_v56  ;;  %v373_v62 = vadd.f32 %v372_v60, %v278_v56  ;;  %621 = vmatmul.f32.vlgmr.msra.gmra.mxu2 %v447_v57  ;;  %728 = vmatmul.msk.f32.vlgmr.msra.gmra.mxu3 %vm525_vm2, %v448_v58 }
 0x148   :  { %v453_v63 = vmax.f32 %v341_v61, 0.0  ;;  %v454_v0 = vmax.f32 %v373_v62, 0.0 }
 0x149   :  { %v401_v1 = vpop.f32.mrf.mxu2  ;;  %v433_v2 = vpop.f32.mrf.mxu3 }
 0x14a   :  { %v402_v3 = vadd.f32 %v401_v1, %v273_v45  ;;  %v434_v4 = vadd.f32 %v433_v2, %v273_v45  ;;  %563 = vmatmul.f32.gmra.mxu0 %v453_v63  ;;  %595 = vmatmul.f32.gmra.mxu1 %v454_v0 }
 0x14c   :  { %v451_v6 = vmax.f32 %v402_v3, 0.0  ;;  %v452_v7 = vmax.f32 %v434_v4, 0.0 }
 0x14d   :  { %v343_v8 = vpop.f32.mrf.mxu0  ;;  %v375_v9 = vpop.f32.mrf.mxu1 }
 0x14e   :  { %v344_v10 = vadd.f32 %v343_v8, %v283_v5  ;;  %v376_v11 = vadd.f32 %v375_v9, %v283_v5  ;;  %624 = vmatmul.f32.gmra.mxu2 %v451_v6  ;;  %729 = vmatmul.msk.f32.gmra.mxu3 %vm525_vm2, %v452_v7 }
 0x150   :  { %v457_v12 = vmax.f32 %v344_v10, 0.0  ;;  %v458_v13 = vmax.f32 %v376_v11, 0.0 }
 0x151   :  { %v404_v14 = vpop.f32.mrf.mxu2  ;;  %v436_v15 = vpop.f32.mrf.mxu3 }
 0x152   :  { %v405_v16 = vadd.f32 %v404_v14, %v278_v56  ;;  %v437_v17 = vadd.f32 %v436_v15, %v278_v56  ;;  %566 = vmatmul.f32.gmra.mxu0 %v457_v12  ;;  %598 = vmatmul.f32.gmra.mxu1 %v458_v13 }
 0x154   :  { %v455_v19 = vmax.f32 %v405_v16, 0.0  ;;  %v456_v20 = vmax.f32 %v437_v17, 0.0 }
 0x155   :  { %v346_v21 = vpop.f32.mrf.mxu0  ;;  %v378_v22 = vpop.f32.mrf.mxu1 }
 0x156   :  { %v347_v23 = vadd.f32 %v346_v21, %v288_v18  ;;  %v379_v24 = vadd.f32 %v378_v22, %v288_v18  ;;  %627 = vmatmul.f32.gmra.mxu2 %v455_v19  ;;  %730 = vmatmul.msk.f32.gmra.mxu3 %vm525_vm2, %v456_v20 }
 0x158   :  { %v461_v25 = vmax.f32 %v347_v23, 0.0  ;;  %v462_v26 = vmax.f32 %v379_v24, 0.0 }
 0x159   :  { %v407_v27 = vpop.f32.mrf.mxu2  ;;  %v439_v28 = vpop.f32.mrf.mxu3 }
 0x15a   :  { %v408_v29 = vadd.f32 %v407_v27, %v283_v5  ;;  %v440_v30 = vadd.f32 %v439_v28, %v283_v5  ;;  %569 = vmatmul.f32.gmra.mxu0 %v461_v25  ;;  %601 = vmatmul.f32.gmra.mxu1 %v462_v26 }
 0x15c   :  { %v459_v31 = vmax.f32 %v408_v29, 0.0  ;;  %v460_v32 = vmax.f32 %v440_v30, 0.0 }
 0x15e   :  { %630 = vmatmul.f32.gmra.mxu2 %v459_v31  ;;  %731 = vmatmul.msk.f32.gmra.mxu3 %vm525_vm2, %v460_v32 }
 0x161   :  { %v410_v33 = vpop.f32.mrf.mxu2  ;;  %v442_v34 = vpop.f32.mrf.mxu3 }
 0x162   :  { %v411_v35 = vadd.f32 %v410_v33, %v288_v18  ;;  %v443_v36 = vadd.f32 %v442_v34, %v288_v18 }
 0x164   :  { %v463_v37 = vmax.f32 %v411_v35, 0.0  ;;  %v464_v38 = vmax.f32 %v443_v36, 0.0 }
 0x166   :  { %633 = vmatmul.f32.gmra.mxu2 %v463_v37  ;;  %732 = vmatmul.msk.f32.gmra.mxu3 %vm525_vm2, %v464_v38 }
 0x1b7   :  { %v558_v39 = vpop.f32.mrf.mxu0  ;;  %v590_v40 = vpop.f32.mrf.mxu1 }
 0x1b8   :  { %v591_v43 = vadd.f32 %v590_v40, %v558_v39 }
 0x1bf   :  { %v561_v41 = vpop.f32.mrf.mxu0  ;;  %v593_v42 = vpop.f32.mrf.mxu1 }
 0x1c0   :  { %v594_v48 = vadd.f32 %v593_v42, %v561_v41 }
 0x1c7   :  { %v564_v49 = vpop.f32.mrf.mxu0  ;;  %v596_v50 = vpop.f32.mrf.mxu1 }
 0x1c8   :  { %v597_v55 = vadd.f32 %v596_v50, %v564_v49 }
 0x1c9   :  { %v622_v44 = vpop.f32.mrf.mxu2  ;;  %v654_v45 = vpop.f32.mrf.mxu3 }
 0x1ca   :  { %v623_v46 = vadd.f32 %v622_v44, %v591_v43 }
 0x1cc   :  { %v655_v47 = vadd.f32 %v654_v45, %v623_v46 }
 0x1ce   :  { %670 = vst.msk [vmem:[%s1157_s6] sm:$0xff] %vm669_vm3, %v655_v47 }
 0x1cf   :  { %v567_v59 = vpop.f32.mrf.mxu0  ;;  %v599_v60 = vpop.f32.mrf.mxu1 }
 0x1d0   :  { %v600_v62 = vadd.f32 %v599_v60, %v567_v59 }
 0x1d1   :  { %v625_v51 = vpop.f32.mrf.mxu2  ;;  %v657_v52 = vpop.f32.mrf.mxu3 }
 0x1d2   :  { %v626_v53 = vadd.f32 %v625_v51, %v594_v48 }
 0x1d4   :  { %v658_v54 = vadd.f32 %v657_v52, %v626_v53 }
 0x1d6   :  { %671 = vst.msk [vmem:[%s1157_s6 + $0x8] sm:$0xff] %vm669_vm3, %v658_v54 }
 0x1d7   :  { %v570_v3 = vpop.f32.mrf.mxu0  ;;  %v602_v4 = vpop.f32.mrf.mxu1 }
 0x1d8   :  { %v603_v5 = vadd.f32 %v602_v4, %v570_v3 }
 0x1d9   :  { %v628_v56 = vpop.f32.mrf.mxu2  ;;  %v660_v57 = vpop.f32.mrf.mxu3 }
 0x1da   :  { %v629_v58 = vadd.f32 %v628_v56, %v597_v55 }
 0x1dc   :  { %v661_v61 = vadd.f32 %v660_v57, %v629_v58 }
 0x1de   :  { %672 = vst.msk [vmem:[%s1157_s6 + $0x10] sm:$0xff] %vm669_vm3, %v661_v61 }
 0x1e1   :  { %v631_v63 = vpop.f32.mrf.mxu2  ;;  %v663_v0 = vpop.f32.mrf.mxu3 }
 0x1e2   :  { %v632_v1 = vadd.f32 %v631_v63, %v600_v62 }
 0x1e4   :  { %v664_v2 = vadd.f32 %v663_v0, %v632_v1 }
 0x1e6   :  { %673 = vst.msk [vmem:[%s1157_s6 + $0x18] sm:$0xff] %vm669_vm3, %v664_v2 }
 0x1e9   :  { %v634_v6 = vpop.f32.mrf.mxu2  ;;  %v666_v8 = vpop.f32.mrf.mxu3 }
 0x1ea   :  { %v635_v7 = vadd.f32 %v634_v6, %v603_v5 }
 0x1ec   :  { %v667_v9 = vadd.f32 %v666_v8, %v635_v7 }
 0x1ee   :  { %675 = vst.msk [vmem:[%s1157_s6 + $0x20] sm:$0x3f] %vm674_vm4, %v667_v9 }

// kernel: network_apply.5
= control target key start
LH: loop header
LB: loop body
LE: loop exit
PB: predicated region body
PF: predicated region fallthrough
CT: control target
= control target key end

     0   :  { %vm100_vm0 = vcmask 1046528   ;;  %v217_v2 = vmov 0   ;;  %vm78_vm1 = vcmask 449536   ;;  %vm183_vm2 = vcmask 253952   ;;  %s332_s0 = inlined_call_operand.vmem [shape: f32[55,32], index: 0, kind: input, shape index: {}]   ;;  %s333_s4 = inlined_call_operand.<no memory space> [shape: f32[1,1], index: 4, kind: input, shape index: {}]   ;;  %s334_s2 = inlined_call_operand.vmem [shape: f32[55,1], index: 2, kind: input, shape index: {}]   ;;  %s335_s1 = inlined_call_operand.vmem [shape: f32[55,55], index: 1, kind: input, shape index: {}]   ;;  %s336_s3 = inlined_call_operand.vmem [shape: f32[1,55], index: 3, kind: input, shape index: {}]   ;;  %s337_s5 = inlined_call_operand.vmem [shape: f32[1,32], index: 5, kind: output, shape index: {}]  }
   0x1   :  { %v28_v0 = vld [vmem:[%s332_s0 + $0x30] sm:$0x7f]  ;;  %v27_v1 = vld [vmem:[%s332_s0 + $0x28] sm:$0xff]  ;;  %214 = vset.pattern.permute.xlu0 %v217_v2  ;;  %215 = vset.pattern.permute.xlu1 %v217_v2  ;;  %v10_v3 = vstv %s333_s4  ;;  %v26_v4 = vld [vmem:[%s332_s0 + $0x20] sm:$0xff] }
   0x2   :  { %200 = vmatpush.msk.msra.mxu3 %vm100_vm0, %v28_v0  ;;  %199 = vmatpush.msk.msra.mxu2 %vm100_vm0, %v28_v0  ;;  %11 = vst [vmem:[#allocation2] sm:$0x1] %v10_v3  ;;  %v42_v5 = vld [vmem:[%s334_s2 + $0x30] sm:$0x7f]  ;;  %v25_v6 = vld [vmem:[%s332_s0 + $0x18] sm:$0xff]  ;;  %v40_v7 = vld [vmem:[%s334_s2 + $0x20] sm:$0xff] }
   0x3   :  { %189 = vmatpush.msk.msra.mxu0 %vm100_vm0, %v28_v0  ;;  %216 = vset.pattern.permute.xlu2 %v217_v2  ;;  %v24_v8 = vld [vmem:[%s332_s0 + $0x10] sm:$0xff]  ;;  %v23_v10 = vld [vmem:[%s332_s0 + $0x8] sm:$0xff]  ;;  %v22_v12 = vld [vmem:[%s332_s0] sm:$0xff] }
   0x4   :  { %202 = vmatpush.msra.mxu3 %v27_v1  ;;  %201 = vmatpush.msra.mxu2 %v27_v1  ;;  %v38_v9 = vld [vmem:[%s334_s2 + $0x10] sm:$0xff]  ;;  %v41_v11 = vld [vmem:[%s334_s2 + $0x28] sm:$0xff]  ;;  %v33_v13 = vld [vmem:[%s335_s1 + $0x20] sm:$0xff] }
   0x5   :  { %114 = vmatpush.msra.mxu0 %v27_v1  ;;  %75 = vperm.xlu0 %214, %v42_v5   ;;  %v31_v14 = vld [vmem:[%s335_s1 + $0x10] sm:$0xff]  ;;  %v39_v15 = vld [vmem:[%s334_s2 + $0x18] sm:$0xff]  ;;  %v29_v16 = vld [vmem:[%s335_s1] sm:$0xff] }
   0x6   :  { %204 = vmatpush.msra.mxu3 %v26_v4  ;;  %203 = vmatpush.msra.mxu2 %v26_v4  ;;  %v37_v17 = vld [vmem:[%s334_s2 + $0x8] sm:$0xff]  ;;  %v36_v18 = vld [vmem:[%s334_s2] sm:$0xff]  ;;  %v32_v20 = vld [vmem:[%s335_s1 + $0x18] sm:$0xff] }
   0x7   :  { %115 = vmatpush.msra.mxu0 %v26_v4  ;;  %65 = vperm.xlu1 %215, %v40_v7   ;;  %v34_v19 = vld [vmem:[%s335_s1 + $0x28] sm:$0xff]  ;;  %v35_v23 = vld [vmem:[%s335_s1 + $0x30] sm:$0x7f]  ;;  %v149_v52 = vld [vmem:[%s336_s3] sm:$0x1] }
   0x8   :  { %206 = vmatpush.msra.mxu3 %v25_v6  ;;  %205 = vmatpush.msra.mxu2 %v25_v6  ;;  %v30_v22 = vld [vmem:[%s335_s1 + $0x8] sm:$0xff] }
   0x9   :  { %116 = vmatpush.msra.mxu0 %v25_v6  ;;  %55 = vperm.xlu2 %216, %v38_v9   ;;  %v150_v21 = vld [vmem:[#allocation2] sm:$0x1] }
   0xa   :  { %208 = vmatpush.msra.mxu3 %v24_v8  ;;  %207 = vmatpush.msra.mxu2 %v24_v8 }
   0xb   :  { %117 = vmatpush.msra.mxu0 %v24_v8 }
   0xc   :  { %210 = vmatpush.msra.mxu3 %v23_v10  ;;  %209 = vmatpush.msra.mxu2 %v23_v10 }
   0xd   :  { %118 = vmatpush.msra.mxu0 %v23_v10  ;;  %70 = vperm.xlu0 %214, %v41_v11  }
   0xe   :  { %212 = vmatpush.msra.mxu3 %v22_v12  ;;  %211 = vmatpush.msra.mxu2 %v22_v12 }
   0xf   :  { %194 = vmatmul.msk.f32.vlgmr.msra.gmra.mxu3 %vm78_vm1, %v33_v13  ;;  %192 = vmatmul.msk.f32.vlgmr.msra.gmra.mxu2 %vm78_vm1, %v31_v14 }
  0x10   :  { %119 = vmatpush.msra.mxu0 %v22_v12  ;;  %60 = vperm.xlu1 %215, %v39_v15  }
  0x11   :  { %190 = vmatmul.msk.f32.vlgmr.msra.gmra.mxu0 %vm78_vm1, %v29_v16  ;;  %50 = vperm.xlu2 %216, %v37_v17  }
  0x15   :  { %45 = vperm.xlu0 %214, %v36_v18  }
  0x17   :  { %195 = vmatmul.msk.f32.gmra.mxu3 %vm78_vm1, %v34_v19  ;;  %193 = vmatmul.msk.f32.gmra.mxu2 %vm78_vm1, %v32_v20 }
  0x18   :  { %153 = vperm.xlu1 %215, %v150_v21  }
  0x19   :  { %191 = vmatmul.msk.f32.gmra.mxu0 %vm78_vm1, %v30_v22 }
  0x1f   :  { %196 = vmatmul.msk.f32.gmra.mxu3 %vm78_vm1, %v35_v23 }
  0x63   :  { %v56_v29 = vpop.permute.xlu2 %55 }
  0x6b   :  { %v51_v41 = vpop.permute.xlu2 %50 }
  0x77   :  { %v76_v25 = vpop.permute.xlu0 %75 }
  0x79   :  { %v66_v28 = vpop.permute.xlu1 %65 }
  0x7f   :  { %v71_v31 = vpop.permute.xlu0 %70 }
  0x82   :  { %v61_v38 = vpop.permute.xlu1 %60 }
  0x87   :  { %v46_v45 = vpop.permute.xlu0 %45 }
  0x8a   :  { %v154_v53 = vpop.permute.xlu1 %153 }
  0x8b   :  { %v156_v54 = vperm.slane %v154_v53, 0 }
  0x8e   :  { %v121_v30 = vpop.f32.mrf.mxu0 }
  0x8f   :  { %v122_v49 = vadd.f32 %v121_v30, %v46_v45 }
  0x91   :  { %v142_v51 = vmax.f32 %v122_v49, 0.0 }
  0x92   :  { %v133_v24 = vpop.f32.mrf.mxu3  ;;  %v127_v26 = vpop.f32.mrf.mxu2 }
  0x93   :  { %v134_v36 = vadd.f32 %v133_v24, %v66_v28  ;;  %v128_v44 = vadd.f32 %v127_v26, %v56_v29 }
  0x95   :  { %v146_v43 = vmax.f32 %v134_v36, 0.0  ;;  %v144_v48 = vmax.f32 %v128_v44, 0.0 }
  0x96   :  { %v124_v42 = vpop.f32.mrf.mxu0 }
  0x97   :  { %v125_v47 = vadd.f32 %v124_v42, %v51_v41 }
  0x99   :  { %v143_v50 = vmax.f32 %v125_v47, 0.0 }
  0x9a   :  { %v136_v27 = vpop.f32.mrf.mxu3  ;;  %v130_v35 = vpop.f32.mrf.mxu2 }
  0x9b   :  { %v137_v33 = vadd.f32 %v136_v27, %v71_v31  ;;  %v131_v40 = vadd.f32 %v130_v35, %v61_v38 }
  0x9d   :  { %v147_v39 = vmax.f32 %v137_v33, 0.0  ;;  %v145_v46 = vmax.f32 %v131_v40, 0.0 }
  0xa2   :  { %v139_v32 = vpop.f32.mrf.mxu3 }
  0xa3   :  { %v140_v34 = vadd.f32 %v139_v32, %v76_v25 }
  0xa5   :  { %v148_v37 = vmax.f32 %v140_v34, 0.0 }
  0xa7   :  { %197 = vmatpush.msk.msra.mxu1 %vm100_vm0, %v148_v37 }
  0xa9   :  { %173 = vmatpush.msra.mxu1 %v147_v39 }
  0xab   :  { %174 = vmatpush.msra.mxu1 %v146_v43 }
  0xad   :  { %175 = vmatpush.msra.mxu1 %v145_v46 }
  0xaf   :  { %176 = vmatpush.msra.mxu1 %v144_v48 }
  0xb1   :  { %177 = vmatpush.msra.mxu1 %v143_v50 }
  0xb3   :  { %178 = vmatpush.msra.mxu1 %v142_v51 }
  0xb4   :  { %198 = vmatmul.msk.f32.vlgmr.msra.gmra.mxu1 %vm78_vm1, %v149_v52 }
 0x131   :  { %v180_v55 = vpop.f32.mrf.mxu1 }
 0x132   :  { %v181_v56 = vadd.f32 %v180_v55, %v156_v54 }
 0x134   :  { %184 = vst.msk [vmem:[%s337_s5] sm:$0x1] %vm183_vm2, %v181_v56 }

</bundles_post_ra>
